<compile_context>
chip_gen: v7x
topology: tpu7x:2x2x1
jax: 0.10.0
libtpu: 0.0.40
codegen_flags: <defaults>
</compile_context>

<pallas_src>
import functools

import jax
import jax.numpy as jnp
from jax import lax
from jax.experimental import pallas as pl
from jax.experimental.pallas import tpu as pltpu

IO_DT = jnp.bfloat16            # storage / MXU-input dtype
ACC_DT = jnp.float32            # accumulator / softmax-math dtype


# ---------------------------------------------------------------------------
# Generation-aware configuration.
# ---------------------------------------------------------------------------
def _device_kind():
    try:
        return jax.devices()[0].device_kind.lower()
    except Exception:
        return ""


_KIND = _device_kind()
_IS_V7 = ("v7" in _KIND) or ("tpu7" in _KIND)
# bf16 EUP path exists on v6e/v7x; not on v5e and older.  Default to f32 if unknown.
_HAS_BF16_EUP = bool(_KIND) and not any(s in _KIND for s in ("v2", "v3", "v4", "v5"))

VMEM_LIMIT = (40 if _IS_V7 else 64) * 1024 * 1024
TR_DEFAULT = 256 if _IS_V7 else 512


def _softmax_rows_f32(x):
    """Numerically-stable f32 softmax over the last axis (EUP approx reciprocal)."""
    m = jnp.max(x, axis=-1, keepdims=True)
    e = jnp.exp(x - m)
    return e * pl.reciprocal(jnp.sum(e, axis=-1, keepdims=True), approx=True)


# ---------------------------------------------------------------------------
# Kernel 1: the three input projections  xA, xB, xC = x@W1, x@W2, x@W3
# Grid (M-tiles, N-tiles, K-tiles); weights streamed as (tk, tn) bf16 panels.
# ---------------------------------------------------------------------------
def _linear3_kernel(x_ref, w1_ref, w2_ref, w3_ref,
                    oa_ref, ob_ref, oc_ref,
                    acc_a, acc_b, acc_c):
    k = pl.program_id(2)

    @pl.when(k == 0)
    def _():
        acc_a[...] = jnp.zeros_like(acc_a)
        acc_b[...] = jnp.zeros_like(acc_b)
        acc_c[...] = jnp.zeros_like(acc_c)

    x = x_ref[...]
    acc_a[...] += jnp.dot(x, w1_ref[...], preferred_element_type=ACC_DT)
    acc_b[...] += jnp.dot(x, w2_ref[...], preferred_element_type=ACC_DT)
    acc_c[...] += jnp.dot(x, w3_ref[...], preferred_element_type=ACC_DT)

    @pl.when(k == pl.num_programs(2) - 1)
    def _():
        oa_ref[...] = acc_a[...].astype(oa_ref.dtype)
        ob_ref[...] = acc_b[...].astype(ob_ref.dtype)
        oc_ref[...] = acc_c[...].astype(oc_ref.dtype)


def _linear3(x2d, w1, w2, w3, *, tm, tn, tk):
    M, D = x2d.shape
    n_m, n_n, n_k = M // tm, D // tn, D // tk
    x_spec = pl.BlockSpec((tm, tk), lambda m, n, k: (m, k))
    w_spec = pl.BlockSpec((tk, tn), lambda m, n, k: (k, n))
    o_spec = pl.BlockSpec((tm, tn), lambda m, n, k: (m, n))
    out_sh = jax.ShapeDtypeStruct((M, D), IO_DT)
    cost = pl.CostEstimate(
        flops=3 * 2 * M * D * D,
        transcendentals=0,
        bytes_accessed=2 * (3 * n_m * D * D + n_n * M * D + 3 * M * D))
    return pl.pallas_call(
        _linear3_kernel,
        out_shape=(out_sh, out_sh, out_sh),
        grid_spec=pltpu.PrefetchScalarGridSpec(
            num_scalar_prefetch=0,
            grid=(n_m, n_n, n_k),
            in_specs=[x_spec, w_spec, w_spec, w_spec],
            out_specs=(o_spec, o_spec, o_spec),
            scratch_shapes=[pltpu.VMEM((tm, tn), ACC_DT)] * 3),
        compiler_params=pltpu.CompilerParams(
            dimension_semantics=("parallel", "parallel", "arbitrary"),
            vmem_limit_bytes=VMEM_LIMIT),
        cost_estimate=cost,
    )(x2d, w1, w2, w3)


# ---------------------------------------------------------------------------
# Kernel 2: the "square attention" part, row-blocked so the (D, D) softmax
# matrix is never materialized.
#   per row-block r:  sq = xA[:, r].T @ xB  -> row softmax ->
#                     acc += xC[:, r] @ softmax(sq)
#   at the last r:    xO = softmax(acc, axis=-1)
# EUP-bound: ~D^2 exps per batch element; bf16 exp path on v6e/v7x, f32 on v5e.
# ---------------------------------------------------------------------------
def _square_attn_kernel(use_bf16_exp, xa_ref, xb_ref, xc_ref, o_ref, acc_ref):
    r = pl.program_id(1)

    @pl.when(r == 0)
    def _():
        acc_ref[...] = jnp.zeros_like(acc_ref)

    xa = xa_ref[0]            # (S, TR) bf16
    xb = xb_ref[0]            # (S, D)  bf16
    xc = xc_ref[0]            # (S, TR) bf16

    # TR complete rows of xSquare = xA^T @ xB (contraction over the sequence axis).
    sq = lax.dot_general(xa, xb, (((0,), (0,)), ((), ())),
                         preferred_element_type=ACC_DT)          # (TR, D) f32

    # Row softmax.
    m = jnp.max(sq, axis=-1, keepdims=True)                      # f32 row max
    if use_bf16_exp:
        # bf16 EUP exp (~2x on v6e/v7x); f32 row-sum re-accumulation.
        e = jnp.exp((sq - m).astype(IO_DT))                       # (TR, D) bf16
        s = jnp.sum(e, axis=-1, keepdims=True, dtype=ACC_DT)      # (TR, 1) f32
        p = e * pl.reciprocal(s, approx=True).astype(IO_DT)       # bf16
    else:
        e = jnp.exp(sq - m)
        s = jnp.sum(e, axis=-1, keepdims=True)
        p = (e * pl.reciprocal(s, approx=True)).astype(IO_DT)

    acc_ref[...] += jnp.dot(xc, p, preferred_element_type=ACC_DT)  # (S, D) f32

    @pl.when(r == pl.num_programs(1) - 1)
    def _():
        o_ref[0] = _softmax_rows_f32(acc_ref[...]).astype(o_ref.dtype)


def _square_attention(xa, xb, xc, *, tr):
    B, S, D = xa.shape
    blk_spec = pl.BlockSpec((1, S, tr), lambda b, r: (b, 0, r))
    full_spec = pl.BlockSpec((1, S, D), lambda b, r: (b, 0, 0))
    cost = pl.CostEstimate(flops=4 * B * S * D * D,
                           transcendentals=B * (D * D + S * D),
                           bytes_accessed=2 * 4 * B * S * D)
    return pl.pallas_call(
        functools.partial(_square_attn_kernel, _HAS_BF16_EUP),
        out_shape=jax.ShapeDtypeStruct((B, S, D), IO_DT),
        grid_spec=pltpu.PrefetchScalarGridSpec(
            num_scalar_prefetch=0,
            grid=(B, D // tr),
            in_specs=[blk_spec, full_spec, blk_spec],
            out_specs=full_spec,
            scratch_shapes=[pltpu.VMEM((S, D), ACC_DT)]),
        compiler_params=pltpu.CompilerParams(
            dimension_semantics=("parallel", "arbitrary"),
            vmem_limit_bytes=VMEM_LIMIT),
        cost_estimate=cost,
    )(xa, xb, xc)


# ---------------------------------------------------------------------------
# Kernel 3: li4 + SiLU + residual-add epilogue (tiled weight streaming).
#   r = x + silu(xo @ W4)      (sigmoid via tanh: one EUP op)
# ---------------------------------------------------------------------------
def _silu_resid_kernel(xo_ref, xres_ref, w_ref, o_ref, acc_ref):
    k = pl.program_id(2)

    @pl.when(k == 0)
    def _():
        acc_ref[...] = jnp.zeros_like(acc_ref)

    acc_ref[...] += jnp.dot(xo_ref[...], w_ref[...],
                            preferred_element_type=ACC_DT)

    @pl.when(k == pl.num_programs(2) - 1)
    def _():
        a = acc_ref[...]
        sig = 0.5 * (1.0 + jnp.tanh(0.5 * a))            # sigmoid(a), one EUP op
        o_ref[...] = (xres_ref[...].astype(ACC_DT) + a * sig).astype(o_ref.dtype)


def _silu_resid(xo2d, xres2d, w, *, tm, tn, tk):
    M, D = xo2d.shape
    n_m, n_n, n_k = M // tm, D // tn, D // tk
    xo_spec = pl.BlockSpec((tm, tk), lambda m, n, k: (m, k))
    xr_spec = pl.BlockSpec((tm, tn), lambda m, n, k: (m, n))   # epilogue only
    w_spec = pl.BlockSpec((tk, tn), lambda m, n, k: (k, n))
    o_spec = pl.BlockSpec((tm, tn), lambda m, n, k: (m, n))
    cost = pl.CostEstimate(
        flops=2 * M * D * D,
        transcendentals=M * D,
        bytes_accessed=2 * (n_m * D * D + n_n * M * D + 2 * M * D))
    return pl.pallas_call(
        _silu_resid_kernel,
        out_shape=jax.ShapeDtypeStruct((M, D), IO_DT),
        grid_spec=pltpu.PrefetchScalarGridSpec(
            num_scalar_prefetch=0,
            grid=(n_m, n_n, n_k),
            in_specs=[xo_spec, xr_spec, w_spec],
            out_specs=o_spec,
            scratch_shapes=[pltpu.VMEM((tm, tn), ACC_DT)]),
        compiler_params=pltpu.CompilerParams(
            dimension_semantics=("parallel", "parallel", "arbitrary"),
            vmem_limit_bytes=VMEM_LIMIT),
        cost_estimate=cost,
    )(xo2d, xres2d, w)


# ---------------------------------------------------------------------------
# Kernel 4: plain streamed matmul  y = r @ Wo  (the output projection).
# ---------------------------------------------------------------------------
def _matmul_kernel(x_ref, w_ref, o_ref, acc_ref):
    k = pl.program_id(2)

    @pl.when(k == 0)
    def _():
        acc_ref[...] = jnp.zeros_like(acc_ref)

    acc_ref[...] += jnp.dot(x_ref[...], w_ref[...],
                            preferred_element_type=ACC_DT)

    @pl.when(k == pl.num_programs(2) - 1)
    def _():
        o_ref[...] = acc_ref[...].astype(o_ref.dtype)


def _matmul(x2d, w, *, tm, tn, tk):
    M, D = x2d.shape
    n_m, n_n, n_k = M // tm, D // tn, D // tk
    x_spec = pl.BlockSpec((tm, tk), lambda m, n, k: (m, k))
    w_spec = pl.BlockSpec((tk, tn), lambda m, n, k: (k, n))
    o_spec = pl.BlockSpec((tm, tn), lambda m, n, k: (m, n))
    cost = pl.CostEstimate(
        flops=2 * M * D * D,
        transcendentals=0,
        bytes_accessed=2 * (n_m * D * D + n_n * M * D + M * D))
    return pl.pallas_call(
        _matmul_kernel,
        out_shape=jax.ShapeDtypeStruct((M, D), IO_DT),
        grid_spec=pltpu.PrefetchScalarGridSpec(
            num_scalar_prefetch=0,
            grid=(n_m, n_n, n_k),
            in_specs=[x_spec, w_spec],
            out_specs=o_spec,
            scratch_shapes=[pltpu.VMEM((tm, tn), ACC_DT)]),
        compiler_params=pltpu.CompilerParams(
            dimension_semantics=("parallel", "parallel", "arbitrary"),
            vmem_limit_bytes=VMEM_LIMIT),
        cost_estimate=cost,
    )(x2d, w)


# ---------------------------------------------------------------------------
# Block / unit wrappers.
# ---------------------------------------------------------------------------
def bad_transformer_block(x, w1, w2, w3, w4, wo, *, tm=256, tn=1024, tk=1024, tr=None):
    """One myBadTransfomerBlock forward. x: (B, S, D) bf16; weights (D, D) bf16."""
    B, S, D = x.shape
    M = B * S
    if tr is None:
        tr = TR_DEFAULT
    tm = min(tm, M)
    tn = min(tn, D)
    tk = min(tk, D)
    tr = min(tr, D)
    assert M % tm == 0 and D % tn == 0 and D % tk == 0 and D % tr == 0
    assert tm % 8 == 0 and tn % 128 == 0 and tk % 128 == 0
    assert tr % 128 == 0 or tr == D

    x2 = x.reshape(M, D)

    # li1 / li2 / li3, batched over all B*S rows.
    xa, xb, xc = _linear3(x2, w1, w2, w3, tm=tm, tn=tn, tk=tk)

    # xSquare softmax + xO contraction + second softmax (per batch element).
    xo = _square_attention(xa.reshape(B, S, D),
                           xb.reshape(B, S, D),
                           xc.reshape(B, S, D), tr=tr)

    # li4 + SiLU + residual add fused; then the output projection.
    r = _silu_resid(xo.reshape(M, D), x2, w4, tm=tm, tn=tn, tk=tk)
    y = _matmul(r, wo, tm=tm, tn=tn, tk=tk)
    return y.reshape(B, S, D)


def bad_transformer_unit(x, layer_params, **tiles):
    """myBadTransformerUnit forward: stack of blocks (bf16 storage, f32 accum)."""
    x = x.astype(IO_DT)
    for (w1, w2, w3, w4, wo) in layer_params:
        x = bad_transformer_block(x, w1, w2, w3, w4, wo, **tiles)
    return x


# ---------------------------------------------------------------------------
# Pure-JAX reference mirroring the same bf16/f32 dtype policy, for verification.
# ---------------------------------------------------------------------------
def _ref_block(x, w1, w2, w3, w4, wo):
    f32 = jnp.float32

    def lin(a, w):
        return jnp.einsum("bsd,de->bse", a.astype(f32), w.astype(f32))

    xa = lin(x, w1).astype(IO_DT)
    xb = lin(x, w2).astype(IO_DT)
    xc = lin(x, w3).astype(IO_DT)
    sq = jnp.einsum("bsi,bsj->bij", xa.astype(f32), xb.astype(f32))
    p = jax.nn.softmax(sq, axis=-1).astype(IO_DT)
    xo = jnp.einsum("bsi,bij->bsj", xc.astype(f32), p.astype(f32))
    xo = jax.nn.softmax(xo, axis=-1).astype(IO_DT)
    h = lin(xo, w4)                      # f32
    h = h * jax.nn.sigmoid(h)            # f32 SiLU
    r = (x.astype(f32) + h).astype(IO_DT)
    return lin(r, wo).astype(IO_DT)


def _ref_unit(x, layer_params):
    x = x.astype(IO_DT)
    for p in layer_params:
        x = _ref_block(x, *p)
    return x


def make_params(key, num_layers, D):
    """Deterministic weight init. Weights are (D_in, D_out) == pytorch W.T, bf16."""
    params = []
    scale = 1.0 / jnp.sqrt(jnp.float32(D))
    for _ in range(num_layers):
        layer = []
        for _ in range(5):
            key, sub = jax.random.split(key)
            w = jax.random.normal(sub, (D, D), jnp.float32) * scale
            layer.append(w.astype(IO_DT))
        params.append(tuple(layer))
    return params


def _run_case(key, B, S, D, num_layers, **tiles):
    key, xkey = jax.random.split(key)
    x = jax.random.normal(xkey, (B, S, D), jnp.float32)
    params = make_params(key, num_layers, D)

    run = jax.jit(functools.partial(bad_transformer_unit,
                                    layer_params=params, **tiles))
    out = jax.block_until_ready(run(x))

    ref = _ref_unit(x, params)
    assert out.shape == (B, S, D)
    out_f = out.astype(jnp.float32)
    ref_f = ref.astype(jnp.float32)
    max_err = float(jnp.max(jnp.abs(out_f - ref_f)))
    assert jnp.allclose(out_f, ref_f, atol=5e-2, rtol=5e-2), (
        f"mismatch vs reference at D={D} (max abs err {max_err})")


if __name__ == "__main__":
    key = jax.random.PRNGKey(0)
    key, k1, k2 = jax.random.split(key, 3)

    # Case 1: small stand-in for the 4096-wide module (every grid axis == 1).
    _run_case(k1, B=2, S=8, D=128, num_layers=2)

    # Case 2: exercise the multi-tile paths on hardware — all of the m/n/k/r grid
    # axes are > 1, so accumulator init/finalize, revisited output blocks and the
    # row-blocked softmax (tr < D) all run.
    _run_case(k2, B=2, S=8, D=512, num_layers=1, tm=8, tn=256, tk=256, tr=128)

    print("KERNEL_OK")
</pallas_src>

<mosaic_0001>
module attributes {stable_mosaic.version = 11 : i64} {
  func.func @_silu_resid_kernel(%arg0: i32, %arg1: i32, %arg2: i32, %arg3: memref<16x128xbf16, #tpu.memory_space<vmem>>, %arg4: memref<16x128xbf16, #tpu.memory_space<vmem>>, %arg5: memref<128x128xbf16, #tpu.memory_space<vmem>>, %arg6: memref<16x128xbf16, #tpu.memory_space<vmem>>, %arg7: memref<16x128xf32, #tpu.memory_space<vmem>>) attributes {dimension_semantics = [#tpu.dimension_semantics<parallel>, #tpu.dimension_semantics<parallel>, #tpu.dimension_semantics<arbitrary>], iteration_bounds = array<i64: 1, 1, 1>, scalar_prefetch = 0 : i64, scratch_operands = 1 : i64, tpu.core_type = #tpu.core_type<tc>, window_params = [{transform_indices = @transform_0, window_bounds = array<i64: 16, 128>}, {transform_indices = @transform_1, window_bounds = array<i64: 16, 128>}, {transform_indices = @transform_2, window_bounds = array<i64: 128, 128>}, {transform_indices = @transform_3, window_bounds = array<i64: 16, 128>}]} {
    %c0_i32 = arith.constant 0 : i32
    %0 = arith.cmpi eq, %arg2, %c0_i32 : i32
    %1 = arith.extui %0 : i1 to i32
    %c0_i32_0 = arith.constant 0 : i32
    %2 = arith.cmpi ne, %1, %c0_i32_0 : i32
    scf.if %2 {
      %cst_10 = arith.constant 0.000000e+00 : f32
      %12 = vector.broadcast %cst_10 : f32 to vector<16x128xf32>
      %c0_11 = arith.constant 0 : index
      %c0_12 = arith.constant 0 : index
      %13 = vector.load %arg7[%c0_11, %c0_12] : memref<16x128xf32, #tpu.memory_space<vmem>>, vector<16x128xf32>
      tpu.vector_store %arg7[%c0_11, %c0_12], %12 {strides = array<i32>} : memref<16x128xf32, #tpu.memory_space<vmem>>, vector<16x128xf32>,
    } else {
    }
    %c0 = arith.constant 0 : index
    %c0_1 = arith.constant 0 : index
    %3 = vector.load %arg7[%c0, %c0_1] : memref<16x128xf32, #tpu.memory_space<vmem>>, vector<16x128xf32>
    %c0_2 = arith.constant 0 : index
    %c0_3 = arith.constant 0 : index
    %4 = vector.load %arg3[%c0_2, %c0_3] : memref<16x128xbf16, #tpu.memory_space<vmem>>, vector<16x128xbf16>
    %c0_4 = arith.constant 0 : index
    %c0_5 = arith.constant 0 : index
    %5 = vector.load %arg5[%c0_4, %c0_5] : memref<128x128xbf16, #tpu.memory_space<vmem>>, vector<128x128xbf16>
    %cst = arith.constant dense<0.000000e+00> : vector<16x128xf32>
    %6 = tpu.matmul %4, %5, %cst {dimension_numbers = #tpu.dot_dimension_numbers<[1], [0], [0], [1], [0, 0, 1, 1], [], []>} : vector<16x128xbf16>, vector<128x128xbf16>, vector<16x128xf32> -> vector<16x128xf32>
    %7 = arith.addf %3, %6 : vector<16x128xf32>
    %c0_6 = arith.constant 0 : index
    %c0_7 = arith.constant 0 : index
    %8 = vector.load %arg7[%c0_6, %c0_7] : memref<16x128xf32, #tpu.memory_space<vmem>>, vector<16x128xf32>
    tpu.vector_store %arg7[%c0_6, %c0_7], %7 {strides = array<i32>} : memref<16x128xf32, #tpu.memory_space<vmem>>, vector<16x128xf32>,
    %c0_i32_8 = arith.constant 0 : i32
    %9 = arith.cmpi eq, %arg2, %c0_i32_8 : i32
    %10 = arith.extui %9 : i1 to i32
    %c0_i32_9 = arith.constant 0 : i32
    %11 = arith.cmpi ne, %10, %c0_i32_9 : i32
    scf.if %11 {
      %c0_10 = arith.constant 0 : index
      %c0_11 = arith.constant 0 : index
      %12 = vector.load %arg7[%c0_10, %c0_11] : memref<16x128xf32, #tpu.memory_space<vmem>>, vector<16x128xf32>
      %cst_12 = arith.constant 5.000000e-01 : f32
      %13 = vector.broadcast %cst_12 : f32 to vector<16x128xf32>
      %14 = arith.mulf %13, %12 : vector<16x128xf32>
      %15 = math.tanh %14 : vector<16x128xf32>
      %cst_13 = arith.constant 1.000000e+00 : f32
      %16 = vector.broadcast %cst_13 : f32 to vector<16x128xf32>
      %17 = arith.addf %16, %15 : vector<16x128xf32>
      %cst_14 = arith.constant 5.000000e-01 : f32
      %18 = vector.broadcast %cst_14 : f32 to vector<16x128xf32>
      %19 = arith.mulf %18, %17 : vector<16x128xf32>
      %c0_15 = arith.constant 0 : index
      %c0_16 = arith.constant 0 : index
      %20 = vector.load %arg4[%c0_15, %c0_16] : memref<16x128xbf16, #tpu.memory_space<vmem>>, vector<16x128xbf16>
      %21 = arith.extf %20 : vector<16x128xbf16> to vector<16x128xf32>
      %22 = arith.mulf %12, %19 : vector<16x128xf32>
      %23 = arith.addf %21, %22 : vector<16x128xf32>
      %24 = arith.truncf %23 : vector<16x128xf32> to vector<16x128xbf16>
      %c0_17 = arith.constant 0 : index
      %c0_18 = arith.constant 0 : index
      %25 = vector.load %arg6[%c0_17, %c0_18] : memref<16x128xbf16, #tpu.memory_space<vmem>>, vector<16x128xbf16>
      tpu.vector_store %arg6[%c0_17, %c0_18], %24 {strides = array<i32>} : memref<16x128xbf16, #tpu.memory_space<vmem>>, vector<16x128xbf16>,
    } else {
    }
    return
  }
  func.func @transform_0(%arg0: i32, %arg1: i32, %arg2: i32) -> (i32, i32) {
    %c0_i32 = arith.constant 0 : i32
    return %arg0, %arg2 : i32, i32
  }
  func.func @transform_1(%arg0: i32, %arg1: i32, %arg2: i32) -> (i32, i32) {
    %c0_i32 = arith.constant 0 : i32
    return %arg0, %arg1 : i32, i32
  }
  func.func @transform_2(%arg0: i32, %arg1: i32, %arg2: i32) -> (i32, i32) {
    %c0_i32 = arith.constant 0 : i32
    return %arg2, %arg1 : i32, i32
  }
  func.func @transform_3(%arg0: i32, %arg1: i32, %arg2: i32) -> (i32, i32) {
    %c0_i32 = arith.constant 0 : i32
    return %arg0, %arg1 : i32, i32
  }
}

module attributes {stable_mosaic.version = 11 : i64} {
  func.func @_square_attn_kernel(%arg0: i32, %arg1: i32, %arg2: memref<1x8x128xbf16, #tpu.memory_space<vmem>>, %arg3: memref<1x8x128xbf16, #tpu.memory_space<vmem>>, %arg4: memref<1x8x128xbf16, #tpu.memory_space<vmem>>, %arg5: memref<1x8x128xbf16, #tpu.memory_space<vmem>>, %arg6: memref<8x128xf32, #tpu.memory_space<vmem>>) attributes {dimension_semantics = [#tpu.dimension_semantics<parallel>, #tpu.dimension_semantics<arbitrary>], iteration_bounds = array<i64: 2, 1>, scalar_prefetch = 0 : i64, scratch_operands = 1 : i64, tpu.core_type = #tpu.core_type<tc>, window_params = [{transform_indices = @transform_0, window_bounds = array<i64: 1, 8, 128>}, {transform_indices = @transform_1, window_bounds = array<i64: 1, 8, 128>}, {transform_indices = @transform_2, window_bounds = array<i64: 1, 8, 128>}, {transform_indices = @transform_3, window_bounds = array<i64: 1, 8, 128>}]} {
    %c0_i32 = arith.constant 0 : i32
    %0 = arith.cmpi eq, %arg1, %c0_i32 : i32
    %1 = arith.extui %0 : i1 to i32
    %c0_i32_0 = arith.constant 0 : i32
    %2 = arith.cmpi ne, %1, %c0_i32_0 : i32
    scf.if %2 {
      %cst_18 = arith.constant 0.000000e+00 : f32
      %30 = vector.broadcast %cst_18 : f32 to vector<8x128xf32>
      %c0_19 = arith.constant 0 : index
      %c0_20 = arith.constant 0 : index
      %31 = vector.load %arg6[%c0_19, %c0_20] : memref<8x128xf32, #tpu.memory_space<vmem>>, vector<8x128xf32>
      tpu.vector_store %arg6[%c0_19, %c0_20], %30 {strides = array<i32>} : memref<8x128xf32, #tpu.memory_space<vmem>>, vector<8x128xf32>,
    } else {
    }
    %c0 = arith.constant 0 : index
    %c0_1 = arith.constant 0 : index
    %c0_2 = arith.constant 0 : index
    %3 = vector.load %arg2[%c0, %c0_1, %c0_2] : memref<1x8x128xbf16, #tpu.memory_space<vmem>>, vector<1x8x128xbf16>
    %4 = vector.shape_cast %3 : vector<1x8x128xbf16> to vector<8x128xbf16>
    %c0_3 = arith.constant 0 : index
    %c0_4 = arith.constant 0 : index
    %c0_5 = arith.constant 0 : index
    %5 = vector.load %arg3[%c0_3, %c0_4, %c0_5] : memref<1x8x128xbf16, #tpu.memory_space<vmem>>, vector<1x8x128xbf16>
    %6 = vector.shape_cast %5 : vector<1x8x128xbf16> to vector<8x128xbf16>
    %c0_6 = arith.constant 0 : index
    %c0_7 = arith.constant 0 : index
    %c0_8 = arith.constant 0 : index
    %7 = vector.load %arg4[%c0_6, %c0_7, %c0_8] : memref<1x8x128xbf16, #tpu.memory_space<vmem>>, vector<1x8x128xbf16>
    %8 = vector.shape_cast %7 : vector<1x8x128xbf16> to vector<8x128xbf16>
    %cst = arith.constant dense<0.000000e+00> : vector<128x128xf32>
    %9 = tpu.matmul %4, %6, %cst {dimension_numbers = #tpu.dot_dimension_numbers<[0], [0], [1], [1], [0, 1, 1, 1], [], []>} : vector<8x128xbf16>, vector<8x128xbf16>, vector<128x128xf32> -> vector<128x128xf32>
    %cst_9 = arith.constant dense<0xFF800000> : vector<128xf32>
    %10 = vector.multi_reduction <maximumf>, %9, %cst_9 [1] : vector<128x128xf32> to vector<128xf32>
    %11 = vector.shape_cast %10 : vector<128xf32> to vector<128x1xf32>
    %12 = vector.broadcast %11 : vector<128x1xf32> to vector<128x128xf32>
    %13 = arith.subf %9, %12 : vector<128x128xf32>
    %14 = arith.truncf %13 : vector<128x128xf32> to vector<128x128xbf16>
    %15 = math.exp %14 : vector<128x128xbf16>
    %16 = arith.extf %15 : vector<128x128xbf16> to vector<128x128xf32>
    %cst_10 = arith.constant dense<0.000000e+00> : vector<128xf32>
    %17 = vector.multi_reduction <add>, %16, %cst_10 [1] : vector<128x128xf32> to vector<128xf32>
    %18 = vector.shape_cast %17 : vector<128xf32> to vector<128x1xf32>
    %19 = tpu.reciprocal %18 {approx = true} : vector<128x1xf32> -> vector<128x1xf32>
    %20 = arith.truncf %19 : vector<128x1xf32> to vector<128x1xbf16>
    %21 = vector.broadcast %20 : vector<128x1xbf16> to vector<128x128xbf16>
    %22 = arith.mulf %15, %21 : vector<128x128xbf16>
    %c0_11 = arith.constant 0 : index
    %c0_12 = arith.constant 0 : index
    %23 = vector.load %arg6[%c0_11, %c0_12] : memref<8x128xf32, #tpu.memory_space<vmem>>, vector<8x128xf32>
    %cst_13 = arith.constant dense<0.000000e+00> : vector<8x128xf32>
    %24 = tpu.matmul %8, %22, %cst_13 {dimension_numbers = #tpu.dot_dimension_numbers<[1], [0], [0], [1], [0, 0, 1, 1], [], []>} : vector<8x128xbf16>, vector<128x128xbf16>, vector<8x128xf32> -> vector<8x128xf32>
    %25 = arith.addf %23, %24 : vector<8x128xf32>
    %c0_14 = arith.constant 0 : index
    %c0_15 = arith.constant 0 : index
    %26 = vector.load %arg6[%c0_14, %c0_15] : memref<8x128xf32, #tpu.memory_space<vmem>>, vector<8x128xf32>
    tpu.vector_store %arg6[%c0_14, %c0_15], %25 {strides = array<i32>} : memref<8x128xf32, #tpu.memory_space<vmem>>, vector<8x128xf32>,
    %c0_i32_16 = arith.constant 0 : i32
    %27 = arith.cmpi eq, %arg1, %c0_i32_16 : i32
    %28 = arith.extui %27 : i1 to i32
    %c0_i32_17 = arith.constant 0 : i32
    %29 = arith.cmpi ne, %28, %c0_i32_17 : i32
    scf.if %29 {
      %c0_18 = arith.constant 0 : index
      %c0_19 = arith.constant 0 : index
      %30 = vector.load %arg6[%c0_18, %c0_19] : memref<8x128xf32, #tpu.memory_space<vmem>>, vector<8x128xf32>
      %cst_20 = arith.constant dense<0xFF800000> : vector<8xf32>
      %31 = vector.multi_reduction <maximumf>, %30, %cst_20 [1] : vector<8x128xf32> to vector<8xf32>
      %32 = vector.shape_cast %31 : vector<8xf32> to vector<8x1xf32>
      %33 = vector.broadcast %32 : vector<8x1xf32> to vector<8x128xf32>
      %34 = arith.subf %30, %33 : vector<8x128xf32>
      %35 = math.exp %34 : vector<8x128xf32>
      %cst_21 = arith.constant dense<0.000000e+00> : vector<8xf32>
      %36 = vector.multi_reduction <add>, %35, %cst_21 [1] : vector<8x128xf32> to vector<8xf32>
      %37 = vector.shape_cast %36 : vector<8xf32> to vector<8x1xf32>
      %38 = tpu.reciprocal %37 {approx = true} : vector<8x1xf32> -> vector<8x1xf32>
      %39 = vector.broadcast %38 : vector<8x1xf32> to vector<8x128xf32>
      %40 = arith.mulf %35, %39 : vector<8x128xf32>
      %41 = arith.truncf %40 : vector<8x128xf32> to vector<8x128xbf16>
      %c0_22 = arith.constant 0 : index
      %c0_23 = arith.constant 0 : index
      %c0_24 = arith.constant 0 : index
      %42 = vector.load %arg5[%c0_22, %c0_23, %c0_24] : memref<1x8x128xbf16, #tpu.memory_space<vmem>>, vector<1x8x128xbf16>
      %43 = vector.shape_cast %42 : vector<1x8x128xbf16> to vector<8x128xbf16>
      %44 = vector.shape_cast %41 : vector<8x128xbf16> to vector<1x8x128xbf16>
      tpu.vector_store %arg5[%c0_22, %c0_23, %c0_24], %44 {strides = array<i32>} : memref<1x8x128xbf16, #tpu.memory_space<vmem>>, vector<1x8x128xbf16>,
    } else {
    }
    return
  }
  func.func @transform_0(%arg0: i32, %arg1: i32) -> (i32, i32, i32) {
    %c0_i32 = arith.constant 0 : i32
    %c0_i32_0 = arith.constant 0 : i32
    return %arg0, %c0_i32, %arg1 : i32, i32, i32
  }
  func.func @transform_1(%arg0: i32, %arg1: i32) -> (i32, i32, i32) {
    %c0_i32 = arith.constant 0 : i32
    %c0_i32_0 = arith.constant 0 : i32
    %c0_i32_1 = arith.constant 0 : i32
    return %arg0, %c0_i32, %c0_i32_0 : i32, i32, i32
  }
  func.func @transform_2(%arg0: i32, %arg1: i32) -> (i32, i32, i32) {
    %c0_i32 = arith.constant 0 : i32
    %c0_i32_0 = arith.constant 0 : i32
    return %arg0, %c0_i32, %arg1 : i32, i32, i32
  }
  func.func @transform_3(%arg0: i32, %arg1: i32) -> (i32, i32, i32) {
    %c0_i32 = arith.constant 0 : i32
    %c0_i32_0 = arith.constant 0 : i32
    %c0_i32_1 = arith.constant 0 : i32
    return %arg0, %c0_i32, %c0_i32_0 : i32, i32, i32
  }
}

module attributes {stable_mosaic.version = 11 : i64} {
  func.func @_linear3_kernel(%arg0: i32, %arg1: i32, %arg2: i32, %arg3: memref<16x128xbf16, #tpu.memory_space<vmem>>, %arg4: memref<128x128xbf16, #tpu.memory_space<vmem>>, %arg5: memref<128x128xbf16, #tpu.memory_space<vmem>>, %arg6: memref<128x128xbf16, #tpu.memory_space<vmem>>, %arg7: memref<16x128xbf16, #tpu.memory_space<vmem>>, %arg8: memref<16x128xbf16, #tpu.memory_space<vmem>>, %arg9: memref<16x128xbf16, #tpu.memory_space<vmem>>, %arg10: memref<16x128xf32, #tpu.memory_space<vmem>>, %arg11: memref<16x128xf32, #tpu.memory_space<vmem>>, %arg12: memref<16x128xf32, #tpu.memory_space<vmem>>) attributes {dimension_semantics = [#tpu.dimension_semantics<parallel>, #tpu.dimension_semantics<parallel>, #tpu.dimension_semantics<arbitrary>], iteration_bounds = array<i64: 1, 1, 1>, scalar_prefetch = 0 : i64, scratch_operands = 3 : i64, tpu.core_type = #tpu.core_type<tc>, window_params = [{transform_indices = @transform_0, window_bounds = array<i64: 16, 128>}, {transform_indices = @transform_1, window_bounds = array<i64: 128, 128>}, {transform_indices = @transform_2, window_bounds = array<i64: 128, 128>}, {transform_indices = @transform_3, window_bounds = array<i64: 128, 128>}, {transform_indices = @transform_4, window_bounds = array<i64: 16, 128>}, {transform_indices = @transform_5, window_bounds = array<i64: 16, 128>}, {transform_indices = @transform_6, window_bounds = array<i64: 16, 128>}]} {
    %c0_i32 = arith.constant 0 : i32
    %0 = arith.cmpi eq, %arg2, %c0_i32 : i32
    %1 = arith.extui %0 : i1 to i32
    %c0_i32_0 = arith.constant 0 : i32
    %2 = arith.cmpi ne, %1, %c0_i32_0 : i32
    scf.if %2 {
      %cst_24 = arith.constant 0.000000e+00 : f32
      %22 = vector.broadcast %cst_24 : f32 to vector<16x128xf32>
      %c0_25 = arith.constant 0 : index
      %c0_26 = arith.constant 0 : index
      %23 = vector.load %arg10[%c0_25, %c0_26] : memref<16x128xf32, #tpu.memory_space<vmem>>, vector<16x128xf32>
      tpu.vector_store %arg10[%c0_25, %c0_26], %22 {strides = array<i32>} : memref<16x128xf32, #tpu.memory_space<vmem>>, vector<16x128xf32>,
      %cst_27 = arith.constant 0.000000e+00 : f32
      %24 = vector.broadcast %cst_27 : f32 to vector<16x128xf32>
      %c0_28 = arith.constant 0 : index
      %c0_29 = arith.constant 0 : index
      %25 = vector.load %arg11[%c0_28, %c0_29] : memref<16x128xf32, #tpu.memory_space<vmem>>, vector<16x128xf32>
      tpu.vector_store %arg11[%c0_28, %c0_29], %24 {strides = array<i32>} : memref<16x128xf32, #tpu.memory_space<vmem>>, vector<16x128xf32>,
      %cst_30 = arith.constant 0.000000e+00 : f32
      %26 = vector.broadcast %cst_30 : f32 to vector<16x128xf32>
      %c0_31 = arith.constant 0 : index
      %c0_32 = arith.constant 0 : index
      %27 = vector.load %arg12[%c0_31, %c0_32] : memref<16x128xf32, #tpu.memory_space<vmem>>, vector<16x128xf32>
      tpu.vector_store %arg12[%c0_31, %c0_32], %26 {strides = array<i32>} : memref<16x128xf32, #tpu.memory_space<vmem>>, vector<16x128xf32>,
    } else {
    }
    %c0 = arith.constant 0 : index
    %c0_1 = arith.constant 0 : index
    %3 = vector.load %arg3[%c0, %c0_1] : memref<16x128xbf16, #tpu.memory_space<vmem>>, vector<16x128xbf16>
    %c0_2 = arith.constant 0 : index
    %c0_3 = arith.constant 0 : index
    %4 = vector.load %arg10[%c0_2, %c0_3] : memref<16x128xf32, #tpu.memory_space<vmem>>, vector<16x128xf32>
    %c0_4 = arith.constant 0 : index
    %c0_5 = arith.constant 0 : index
    %5 = vector.load %arg4[%c0_4, %c0_5] : memref<128x128xbf16, #tpu.memory_space<vmem>>, vector<128x128xbf16>
    %cst = arith.constant dense<0.000000e+00> : vector<16x128xf32>
    %6 = tpu.matmul %3, %5, %cst {dimension_numbers = #tpu.dot_dimension_numbers<[1], [0], [0], [1], [0, 0, 1, 1], [], []>} : vector<16x128xbf16>, vector<128x128xbf16>, vector<16x128xf32> -> vector<16x128xf32>
    %7 = arith.addf %4, %6 : vector<16x128xf32>
    %c0_6 = arith.constant 0 : index
    %c0_7 = arith.constant 0 : index
    %8 = vector.load %arg10[%c0_6, %c0_7] : memref<16x128xf32, #tpu.memory_space<vmem>>, vector<16x128xf32>
    tpu.vector_store %arg10[%c0_6, %c0_7], %7 {strides = array<i32>} : memref<16x128xf32, #tpu.memory_space<vmem>>, vector<16x128xf32>,
    %c0_8 = arith.constant 0 : index
    %c0_9 = arith.constant 0 : index
    %9 = vector.load %arg11[%c0_8, %c0_9] : memref<16x128xf32, #tpu.memory_space<vmem>>, vector<16x128xf32>
    %c0_10 = arith.constant 0 : index
    %c0_11 = arith.constant 0 : index
    %10 = vector.load %arg5[%c0_10, %c0_11] : memref<128x128xbf16, #tpu.memory_space<vmem>>, vector<128x128xbf16>
    %cst_12 = arith.constant dense<0.000000e+00> : vector<16x128xf32>
    %11 = tpu.matmul %3, %10, %cst_12 {dimension_numbers = #tpu.dot_dimension_numbers<[1], [0], [0], [1], [0, 0, 1, 1], [], []>} : vector<16x128xbf16>, vector<128x128xbf16>, vector<16x128xf32> -> vector<16x128xf32>
    %12 = arith.addf %9, %11 : vector<16x128xf32>
    %c0_13 = arith.constant 0 : index
    %c0_14 = arith.constant 0 : index
    %13 = vector.load %arg11[%c0_13, %c0_14] : memref<16x128xf32, #tpu.memory_space<vmem>>, vector<16x128xf32>
    tpu.vector_store %arg11[%c0_13, %c0_14], %12 {strides = array<i32>} : memref<16x128xf32, #tpu.memory_space<vmem>>, vector<16x128xf32>,
    %c0_15 = arith.constant 0 : index
    %c0_16 = arith.constant 0 : index
    %14 = vector.load %arg12[%c0_15, %c0_16] : memref<16x128xf32, #tpu.memory_space<vmem>>, vector<16x128xf32>
    %c0_17 = arith.constant 0 : index
    %c0_18 = arith.constant 0 : index
    %15 = vector.load %arg6[%c0_17, %c0_18] : memref<128x128xbf16, #tpu.memory_space<vmem>>, vector<128x128xbf16>
    %cst_19 = arith.constant dense<0.000000e+00> : vector<16x128xf32>
    %16 = tpu.matmul %3, %15, %cst_19 {dimension_numbers = #tpu.dot_dimension_numbers<[1], [0], [0], [1], [0, 0, 1, 1], [], []>} : vector<16x128xbf16>, vector<128x128xbf16>, vector<16x128xf32> -> vector<16x128xf32>
    %17 = arith.addf %14, %16 : vector<16x128xf32>
    %c0_20 = arith.constant 0 : index
    %c0_21 = arith.constant 0 : index
    %18 = vector.load %arg12[%c0_20, %c0_21] : memref<16x128xf32, #tpu.memory_space<vmem>>, vector<16x128xf32>
    tpu.vector_store %arg12[%c0_20, %c0_21], %17 {strides = array<i32>} : memref<16x128xf32, #tpu.memory_space<vmem>>, vector<16x128xf32>,
    %c0_i32_22 = arith.constant 0 : i32
    %19 = arith.cmpi eq, %arg2, %c0_i32_22 : i32
    %20 = arith.extui %19 : i1 to i32
    %c0_i32_23 = arith.constant 0 : i32
    %21 = arith.cmpi ne, %20, %c0_i32_23 : i32
    scf.if %21 {
      %c0_24 = arith.constant 0 : index
      %c0_25 = arith.constant 0 : index
      %22 = vector.load %arg10[%c0_24, %c0_25] : memref<16x128xf32, #tpu.memory_space<vmem>>, vector<16x128xf32>
      %23 = arith.truncf %22 : vector<16x128xf32> to vector<16x128xbf16>
      %c0_26 = arith.constant 0 : index
      %c0_27 = arith.constant 0 : index
      %24 = vector.load %arg7[%c0_26, %c0_27] : memref<16x128xbf16, #tpu.memory_space<vmem>>, vector<16x128xbf16>
      tpu.vector_store %arg7[%c0_26, %c0_27], %23 {strides = array<i32>} : memref<16x128xbf16, #tpu.memory_space<vmem>>, vector<16x128xbf16>,
      %c0_28 = arith.constant 0 : index
      %c0_29 = arith.constant 0 : index
      %25 = vector.load %arg11[%c0_28, %c0_29] : memref<16x128xf32, #tpu.memory_space<vmem>>, vector<16x128xf32>
      %26 = arith.truncf %25 : vector<16x128xf32> to vector<16x128xbf16>
      %c0_30 = arith.constant 0 : index
      %c0_31 = arith.constant 0 : index
      %27 = vector.load %arg8[%c0_30, %c0_31] : memref<16x128xbf16, #tpu.memory_space<vmem>>, vector<16x128xbf16>
      tpu.vector_store %arg8[%c0_30, %c0_31], %26 {strides = array<i32>} : memref<16x128xbf16, #tpu.memory_space<vmem>>, vector<16x128xbf16>,
      %c0_32 = arith.constant 0 : index
      %c0_33 = arith.constant 0 : index
      %28 = vector.load %arg12[%c0_32, %c0_33] : memref<16x128xf32, #tpu.memory_space<vmem>>, vector<16x128xf32>
      %29 = arith.truncf %28 : vector<16x128xf32> to vector<16x128xbf16>
      %c0_34 = arith.constant 0 : index
      %c0_35 = arith.constant 0 : index
      %30 = vector.load %arg9[%c0_34, %c0_35] : memref<16x128xbf16, #tpu.memory_space<vmem>>, vector<16x128xbf16>
      tpu.vector_store %arg9[%c0_34, %c0_35], %29 {strides = array<i32>} : memref<16x128xbf16, #tpu.memory_space<vmem>>, vector<16x128xbf16>,
    } else {
    }
    return
  }
  func.func @transform_0(%arg0: i32, %arg1: i32, %arg2: i32) -> (i32, i32) {
    %c0_i32 = arith.constant 0 : i32
    return %arg0, %arg2 : i32, i32
  }
  func.func @transform_1(%arg0: i32, %arg1: i32, %arg2: i32) -> (i32, i32) {
    %c0_i32 = arith.constant 0 : i32
    return %arg2, %arg1 : i32, i32
  }
  func.func @transform_2(%arg0: i32, %arg1: i32, %arg2: i32) -> (i32, i32) {
    %c0_i32 = arith.constant 0 : i32
    return %arg2, %arg1 : i32, i32
  }
  func.func @transform_3(%arg0: i32, %arg1: i32, %arg2: i32) -> (i32, i32) {
    %c0_i32 = arith.constant 0 : i32
    return %arg2, %arg1 : i32, i32
  }
  func.func @transform_4(%arg0: i32, %arg1: i32, %arg2: i32) -> (i32, i32) {
    %c0_i32 = arith.constant 0 : i32
    return %arg0, %arg1 : i32, i32
  }
  func.func @transform_5(%arg0: i32, %arg1: i32, %arg2: i32) -> (i32, i32) {
    %c0_i32 = arith.constant 0 : i32
    return %arg0, %arg1 : i32, i32
  }
  func.func @transform_6(%arg0: i32, %arg1: i32, %arg2: i32) -> (i32, i32) {
    %c0_i32 = arith.constant 0 : i32
    return %arg0, %arg1 : i32, i32
  }
}

module attributes {stable_mosaic.version = 11 : i64} {
  func.func @_matmul_kernel(%arg0: i32, %arg1: i32, %arg2: i32, %arg3: memref<16x128xbf16, #tpu.memory_space<vmem>>, %arg4: memref<128x128xbf16, #tpu.memory_space<vmem>>, %arg5: memref<16x128xbf16, #tpu.memory_space<vmem>>, %arg6: memref<16x128xf32, #tpu.memory_space<vmem>>) attributes {dimension_semantics = [#tpu.dimension_semantics<parallel>, #tpu.dimension_semantics<parallel>, #tpu.dimension_semantics<arbitrary>], iteration_bounds = array<i64: 1, 1, 1>, scalar_prefetch = 0 : i64, scratch_operands = 1 : i64, tpu.core_type = #tpu.core_type<tc>, window_params = [{transform_indices = @transform_0, window_bounds = array<i64: 16, 128>}, {transform_indices = @transform_1, window_bounds = array<i64: 128, 128>}, {transform_indices = @transform_2, window_bounds = array<i64: 16, 128>}]} {
    %c0_i32 = arith.constant 0 : i32
    %0 = arith.cmpi eq, %arg2, %c0_i32 : i32
    %1 = arith.extui %0 : i1 to i32
    %c0_i32_0 = arith.constant 0 : i32
    %2 = arith.cmpi ne, %1, %c0_i32_0 : i32
    scf.if %2 {
      %cst_10 = arith.constant 0.000000e+00 : f32
      %12 = vector.broadcast %cst_10 : f32 to vector<16x128xf32>
      %c0_11 = arith.constant 0 : index
      %c0_12 = arith.constant 0 : index
      %13 = vector.load %arg6[%c0_11, %c0_12] : memref<16x128xf32, #tpu.memory_space<vmem>>, vector<16x128xf32>
      tpu.vector_store %arg6[%c0_11, %c0_12], %12 {strides = array<i32>} : memref<16x128xf32, #tpu.memory_space<vmem>>, vector<16x128xf32>,
    } else {
    }
    %c0 = arith.constant 0 : index
    %c0_1 = arith.constant 0 : index
    %3 = vector.load %arg6[%c0, %c0_1] : memref<16x128xf32, #tpu.memory_space<vmem>>, vector<16x128xf32>
    %c0_2 = arith.constant 0 : index
    %c0_3 = arith.constant 0 : index
    %4 = vector.load %arg3[%c0_2, %c0_3] : memref<16x128xbf16, #tpu.memory_space<vmem>>, vector<16x128xbf16>
    %c0_4 = arith.constant 0 : index
    %c0_5 = arith.constant 0 : index
    %5 = vector.load %arg4[%c0_4, %c0_5] : memref<128x128xbf16, #tpu.memory_space<vmem>>, vector<128x128xbf16>
    %cst = arith.constant dense<0.000000e+00> : vector<16x128xf32>
    %6 = tpu.matmul %4, %5, %cst {dimension_numbers = #tpu.dot_dimension_numbers<[1], [0], [0], [1], [0, 0, 1, 1], [], []>} : vector<16x128xbf16>, vector<128x128xbf16>, vector<16x128xf32> -> vector<16x128xf32>
    %7 = arith.addf %3, %6 : vector<16x128xf32>
    %c0_6 = arith.constant 0 : index
    %c0_7 = arith.constant 0 : index
    %8 = vector.load %arg6[%c0_6, %c0_7] : memref<16x128xf32, #tpu.memory_space<vmem>>, vector<16x128xf32>
    tpu.vector_store %arg6[%c0_6, %c0_7], %7 {strides = array<i32>} : memref<16x128xf32, #tpu.memory_space<vmem>>, vector<16x128xf32>,
    %c0_i32_8 = arith.constant 0 : i32
    %9 = arith.cmpi eq, %arg2, %c0_i32_8 : i32
    %10 = arith.extui %9 : i1 to i32
    %c0_i32_9 = arith.constant 0 : i32
    %11 = arith.cmpi ne, %10, %c0_i32_9 : i32
    scf.if %11 {
      %c0_10 = arith.constant 0 : index
      %c0_11 = arith.constant 0 : index
      %12 = vector.load %arg6[%c0_10, %c0_11] : memref<16x128xf32, #tpu.memory_space<vmem>>, vector<16x128xf32>
      %13 = arith.truncf %12 : vector<16x128xf32> to vector<16x128xbf16>
      %c0_12 = arith.constant 0 : index
      %c0_13 = arith.constant 0 : index
      %14 = vector.load %arg5[%c0_12, %c0_13] : memref<16x128xbf16, #tpu.memory_space<vmem>>, vector<16x128xbf16>
      tpu.vector_store %arg5[%c0_12, %c0_13], %13 {strides = array<i32>} : memref<16x128xbf16, #tpu.memory_space<vmem>>, vector<16x128xbf16>,
    } else {
    }
    return
  }
  func.func @transform_0(%arg0: i32, %arg1: i32, %arg2: i32) -> (i32, i32) {
    %c0_i32 = arith.constant 0 : i32
    return %arg0, %arg2 : i32, i32
  }
  func.func @transform_1(%arg0: i32, %arg1: i32, %arg2: i32) -> (i32, i32) {
    %c0_i32 = arith.constant 0 : i32
    return %arg2, %arg1 : i32, i32
  }
  func.func @transform_2(%arg0: i32, %arg1: i32, %arg2: i32) -> (i32, i32) {
    %c0_i32 = arith.constant 0 : i32
    return %arg0, %arg1 : i32, i32
  }
}

</mosaic_0001>

<bundles_post_ra>
// kernel: bad_transformer_unit.9
= control target key start
LH: loop header
LB: loop body
LE: loop exit
PB: predicated region body
PF: predicated region fallthrough
CT: control target
= control target key end

     0   :  { %s1541_s0 = inlined_call_operand.hbm [shape: bf16[2,8,128], index: 0, kind: input, shape index: {}]   ;;  %s1542_s1 = inlined_call_operand.hbm [shape: bf16[2,8,128], index: 1, kind: input, shape index: {}]   ;;  %s1543_s2 = inlined_call_operand.hbm [shape: bf16[2,8,128], index: 2, kind: input, shape index: {}]   ;;  %s1544_s3 = inlined_call_operand.hbm [shape: bf16[2,8,128], index: 3, kind: output, shape index: {}]  }
   0x1   :  { %1550 = sst [smem:[#allocation16_spill]] %s1542_s1 }
   0x2   :  { %8 = vsyncpa [#allocation4], 0 }
   0x3   :  { %10 = vsyncpa [#allocation4 + $0x1], 0 }
   0x4   :  { %11 = vsyncpa [#allocation7], 0 }
   0x5   :  { %13 = vsyncpa [#allocation7 + $0x1], 0 }
   0x6   :  { %14 = vsyncpa [#allocation5], 0 }
   0x7   :  { %16 = vsyncpa [#allocation5 + $0x1], 0  ;;  %s1196_s12 = smov 0   ;;  %s1198_s13 = smov 0  }
   0x8   :  { %s1200_s14 = smov 0   ;;  %s1202_s15 = smov 0  }
   0x9   :  { %s1204_s16 = smov 0   ;;  %s1206_s17 = smov 0  }
   0xa LB: > { %1551 = sst [smem:[#allocation13_spill]] %s1164_s16  ;;  %s1227_s18 = sadd.s32 4294967295, %s1168_s17   ;;  %s1168_s17 = sphi %s1206_s17, %s22_s17   ;;  %s1164_s16 = sphi %s1204_s16, %s1572_s16   ;;  %s1160_s15 = sphi %s1202_s15, %s1571_s15   ;;  %s1156_s14 = sphi %s1200_s14, %s1575_s14   ;;  %s1152_s13 = sphi %s1198_s13, %s1574_s13   ;;  %s1148_s12 = sphi %s1196_s12, %s1573_s12  }
   0xb   : > { %s782_s19 = sadd.s32 4294967294, %s1168_s17   ;;  %s34_s20 = sadd.s32 1, %s1164_s16 }
   0xc   : > { %s43_s21 = sadd.s32 1, %s1156_s14  ;;  %p36_p0 = scmp.ge.s32.totalorder %s34_s20, 2 }
   0xd   : > { %p50_p1 = scmp.ne.s32.totalorder %s1156_s14, %s1152_s13  ;;  %p51_p2 = scmp.eq.s32.totalorder %s1168_s17, 0 }
   0xe   : > { %p56_p3 = scmp.ne.s32.totalorder %s1152_s13, %s1148_s12  ;;  %s1577_s20 = smov (%p36_p0, %s34_s20), 0 }
   0xf   : > { %1552 = sst [smem:[#allocation14_spill]] %s1577_s20  ;;  %p1239_p4 = por %p51_p2, %p50_p1 }
  0x10   : > { %p57_p5 = scmp.eq.s32.totalorder %s1227_s18, 0  ;;  %s38_s23 = ssub.s32 %s1164_s16, %s1577_s20 }
  0x11   : > { %p134_p6 = scmp.eq.s32.totalorder %s1227_s18, 1  ;;  %p41_p7 = scmp.eq.s32.totalorder %s38_s23, 0 }
  0x12   : > { %p1247_p8 = por %p57_p5, %p56_p3  ;;  %p140_p10 = scmp.eq.s32.totalorder %s782_s19, 1 }
  0x13   : > { %p1251_p9 = por %p134_p6, %p50_p1  ;;  %p887_p13 = scmp.lt.s32.totalorder %s1168_s17, 2 }
  0x14   : > { %s1554_s24 = scalar_select %p1247_p8, 1, 0 }
  0x15   : > { %s1555_s25 = scalar_select %p1251_p9, 1, 0 }
  0x16   : > { %s1256_s26 = scalar_select %p41_p7, %s1156_s14, %s43_s21  }
  0x17   : > { %p1258_p11 = por %p140_p10, %p56_p3  ;;  %s160_s28 = sand.u32 1, %s1156_s14  }
  0x18   : > { %1556 = sst [smem:[#allocation15_spill]] %s1256_s26  ;;  %s1267_s29 = sshll.u32 %s160_s28, 2 }
  0x19   : > { %s1557_s27 = scalar_select %p1258_p11, 1, 0 }
  0x1a   : > { %s1270_s30 = sshll.u32 %s1164_s16, 6  ;;  %p1274_p0 = pnand %p887_p13, %p1239_p4 }
  0x1b   : > { %s179_s5 = sand.u32 1, %s1168_s17   ;;  %s1559_s1 = sld [smem:[#allocation16_spill]] }
  0x1c   : > { %s1558_s4 = scalar_select %p1274_p0, 1, 0 }
  0x1d   : > { %s183_s9 = scalar_lea.vmem [#allocation6], %s1267_s29  ;;  %s1290_s11 = scalar_lea.sflag [#allocation7], %s179_s5 }
  0x1e   : > { %s190_s10 = sshll.u32 %s183_s9, 4  ;;  %p1296_p4 = pneg %p1274_p0  ;;  %s1287_s10 = int_to_ptr.vmem [resolvable:$true] %s190_s10 }
  0x21   : > { %s1283_s8 = scalar_lea.hbm %s1559_s1, %s1270_s30  ;;  %s997_s6 = scalar_lea.hbm %s1559_s1, 128 }
  0x22   : > { %s992_s19 = scalar_lea.hbm %s1283_s8, 64  ;;  %p998_p7 = scmp.lt.u32.totalorder %s1283_s8, %s1559_s1 }
  0x23   : > { %p993_p3 = scmp.ne.s32.totalorder %s1283_s8, %s992_s19  ;;  %p999_p10 = scmp.lt.u32.totalorder %s997_s6, %s992_s19 }
  0x24   : > { %p1001_p12 = scmp.lt.u32.totalorder %s992_s19, %s1283_s8 }
  0x25   : > { %p995_p5 = pnand %p1296_p4, %p993_p3  ;;  %p1000_p13 = por %p999_p10, %p998_p7 }
  0x27   : > { %p996_p6 = pneg %p995_p5  ;;  %p1002_p1 = por %p1001_p12, %p1000_p13 }
  0x29   : > { %p1003_p2 = pnand %p1002_p1, %p996_p6 }
  0x2b   : > { %1006 = shalt.err (!%p1003_p2)
}
  0x2c   : > { %s1007_s5 = scalar_lea.vmem %s1287_s10, 64  ;;  %s1170_s22 = smov [#allocation6]  }
  0x2d   : > { %p1008_p3 = scmp.ne.s32.totalorder %s1287_s10, %s1007_s5  ;;  %s1012_s23 = sshll.u32 %s1170_s22, 4  ;;  %s1013_s23 = int_to_ptr.vmem [resolvable:$false] %s1012_s23 }
  0x2e   : > { %s1014_s7 = scalar_lea.vmem %s1013_s23, 128  ;;  %p1015_p9 = scmp.lt.s32.totalorder %s1287_s10, %s1013_s23 }
  0x2f   : > { %p1010_p5 = pnand %p1008_p3, %p1296_p4  ;;  %p1016_p8 = scmp.lt.s32.totalorder %s1014_s7, %s1007_s5 }
  0x31   : > { %p1011_p11 = pneg %p1010_p5  ;;  %p1017_p7 = por %p1016_p8, %p1015_p9 }
  0x33   : > { %p1018_p10 = pnand %p1017_p7, %p1011_p11 }
  0x35   : > { %1021 = shalt.err (!%p1018_p10)
}
  0x36   : > { %879 = dma.hbm_to_vmem [thread:$0]  (!%p1274_p0), %s1283_s8, 64, %s1287_s10, %s1290_s11  }
  0x37   : > { %p1561_p12 = scmp.lt.s32.totalorder %s1168_s17, 3  ;;  %p1562_p1 = scmp.ge.s32.totalorder %s1168_s17, 1 }
  0x38   : > { %s1332_s5 = scalar_lea.hbm %s1541_s0, %s1270_s30  ;;  %s164_s22 = scalar_lea.vmem [#allocation3], %s1267_s29 }
  0x39   : > { %p1324_p2 = pnand %p1562_p1, %p1561_p12  ;;  %s172_s23 = sshll.u32 %s164_s22, 4  ;;  %s1335_s23 = int_to_ptr.vmem [resolvable:$true] %s172_s23 }
  0x3a   : > { %s1341_s7 = scalar_lea.hbm %s1543_s2, %s1270_s30  ;;  %s161_s1 = scalar_lea.sflag [#allocation4], %s160_s28 }
  0x3b   : > { %s1563_s19 = scalar_select %p1324_p2, 1, 0 }
  0x3c   : > { %s1022_s20 = scalar_lea.hbm %s1332_s5, 64  ;;  %s1027_s16 = scalar_lea.hbm %s1541_s0, 128 }
  0x3d   : > { %p1023_p8 = scmp.ne.s32.totalorder %s1332_s5, %s1022_s20  ;;  %p1028_p6 = scmp.lt.u32.totalorder %s1332_s5, %s1541_s0 }
  0x3e   : > { %p1029_p13 = scmp.lt.u32.totalorder %s1027_s16, %s1022_s20  ;;  %p1031_p5 = scmp.lt.u32.totalorder %s1022_s20, %s1332_s5 }
  0x3f   : > { %p1025_p9 = pnand %p1023_p8, %p1296_p4 }
  0x40   : > { %p1030_p3 = por %p1029_p13, %p1028_p6 }
  0x41   : > { %p1026_p11 = pneg %p1025_p9 }
  0x42   : > { %p1032_p7 = por %p1031_p5, %p1030_p3 }
  0x44   : > { %p1033_p10 = pnand %p1032_p7, %p1026_p11 }
  0x46   : > { %1036 = shalt.err (!%p1033_p10)
}
  0x47   : > { %s1037_s28 = scalar_lea.vmem %s1335_s23, 64  ;;  %s1171_s30 = smov [#allocation3]  }
  0x48   : > { %p1038_p12 = scmp.ne.s32.totalorder %s1335_s23, %s1037_s28  ;;  %s1042_s8 = sshll.u32 %s1171_s30, 4  ;;  %s1043_s8 = int_to_ptr.vmem [resolvable:$false] %s1042_s8 }
  0x49   : > { %s1044_s26 = scalar_lea.vmem %s1043_s8, 128  ;;  %p1045_p9 = scmp.lt.s32.totalorder %s1335_s23, %s1043_s8 }
  0x4a   : > { %p1040_p1 = pnand %p1038_p12, %p1296_p4  ;;  %p1046_p2 = scmp.lt.s32.totalorder %s1044_s26, %s1037_s28 }
  0x4c   : > { %p1041_p8 = pneg %p1040_p1  ;;  %p1047_p6 = por %p1046_p2, %p1045_p9 }
  0x4e   : > { %p1048_p13 = pnand %p1047_p6, %p1041_p8 }
  0x50   : > { %1051 = shalt.err (!%p1048_p13)
}
  0x51   : > { %876 = dma.hbm_to_vmem [thread:$0]  (!%p1274_p0), %s1332_s5, 64, %s1335_s23, %s161_s1  }
  0x52   : > { %s201_s16 = scalar_lea.vmem [#allocation8], %s1267_s29  ;;  %s1052_s10 = scalar_lea.hbm %s1341_s7, 64 }
  0x53   : > { %s209_s20 = sshll.u32 %s201_s16, 4  ;;  %p1053_p11 = scmp.ne.s32.totalorder %s1341_s7, %s1052_s10  ;;  %s210_s20 = int_to_ptr.vmem [resolvable:$true] %s209_s20 }
  0x54   : > { %s1057_s22 = scalar_lea.hbm %s1543_s2, 128  ;;  %p1058_p5 = scmp.lt.u32.totalorder %s1341_s7, %s1543_s2 }
  0x55   : > { %p1055_p2 = pnand %p1053_p11, %p1296_p4  ;;  %p1059_p7 = scmp.lt.u32.totalorder %s1057_s22, %s1052_s10 }
  0x56   : > { %p1061_p12 = scmp.lt.u32.totalorder %s1052_s10, %s1341_s7 }
  0x57   : > { %p1056_p3 = pneg %p1055_p2  ;;  %p1060_p10 = por %p1059_p7, %p1058_p5 }
  0x59   : > { %p1062_p1 = por %p1061_p12, %p1060_p10 }
  0x5b   : > { %p1063_p8 = pnand %p1062_p1, %p1056_p3 }
  0x5d   : > { %1066 = shalt.err (!%p1063_p8)
}
  0x5e   : > { %s1067_s1 = scalar_lea.vmem %s210_s20, 64  ;;  %s1172_s29 = smov [#allocation8]  }
  0x5f   : > { %p1068_p9 = scmp.ne.s32.totalorder %s210_s20, %s1067_s1  ;;  %s1072_s5 = sshll.u32 %s1172_s29, 4  ;;  %s1073_s5 = int_to_ptr.vmem [resolvable:$false] %s1072_s5 }
  0x60   : > { %s1074_s23 = scalar_lea.vmem %s1073_s5, 128  ;;  %p1075_p11 = scmp.lt.s32.totalorder %s210_s20, %s1073_s5 }
  0x61   : > { %p1070_p6 = pnand %p1068_p9, %p1296_p4  ;;  %p1076_p2 = scmp.lt.s32.totalorder %s1074_s23, %s1067_s1 }
  0x63   : > { %p1071_p13 = pneg %p1070_p6  ;;  %p1077_p0 = por %p1076_p2, %p1075_p11 }
  0x65   : > { %p1078_p5 = pnand %p1077_p0, %p1071_p13 }
  0x67   : > { %1081 = shalt.err (!%p1078_p5)
}
  0x68   : > { %p1564_p7 = scmp.ne.s32.totalorder %s1558_s4, 0  ;;  %p1565_p3 = scmp.ne.s32.totalorder %s1563_s19, 0 }
  0x69   : > { %s1388_s21 = sand.u32 (!%p1565_p3), 1, %s1152_s13   ;;  %p1566_p0 = scmp.ne.s32.totalorder (!%p1565_p3), %s1554_s24, 0 }
  0x6a   : > { %882 = dma.hbm_to_vmem [thread:$0]  (!%p1564_p7), %s1341_s7, 64, %s210_s20, %s1290_s11  }
  0x6b   : > { %218 = sbr.rel (%p1565_p3) target bundleno = 1349 (0x545), region = 32  ;;  %s1391_s8 = sshll.u32 (!%p1565_p3), %s1388_s21, 2 }
  0x6c   : > { %s221_s26 = scalar_lea.sflag (!%p1565_p3), [#allocation4], %s1388_s21  ;;  %s224_s16 = scalar_lea.vmem (!%p1565_p3), [#allocation3], %s1391_s8 }
  0x72   : > { %1135 = dma.done.wait (%p1566_p0), %s221_s26, 64  }
  0x73   : > { %1137 = vsyncadd (%p1566_p0), %s221_s26, 4294967232  ;;  %s229_s4 = sand.u32 1, %s1227_s18   ;;  %s233_s19 = scalar_lea.vmem [#allocation6], %s1391_s8 }
  0x74   : > { %s230_s11 = scalar_lea.sflag [#allocation7], %s229_s4 }
  0x75   : > { %1139 = dma.done.wait (%p1566_p0), %s230_s11, 128  }
  0x76   : > { %1141 = vsyncadd (%p1566_p0), %s230_s11, 4294967168  ;;  %vm325_vm0 = vcmask 1043456   ;;  %v281_v0 = vld [vmem:[%s224_s16] sm:$0xf]  ;;  %v282_v1 = vld [vmem:[%s233_s19] sm:$0xf] }
  0x77   : > { %284 = vxpose.xlu0.c.b16.start.end [1/1] (short) %v281_v0, 128  ;;  %864 = vmatprep.subr.msk.bf16.mxu0 %vm325_vm0, %v282_v1  ;;  %v327_v2 = vsel %vm325_vm0, %v282_v1, 0  ;;  %vm300_vm1 = vcmask 64512   ;;  %vm1174_vm2 = vmmov 0   ;;  %s242_s18 = scalar_lea.vmem [#allocation8], %s1391_s8  ;;  %s805_s24 = sshll.u32 %s1160_s15, 6 }
  0x78   : > { %827 = vmatpush3.bf16.msra.mxu0 %v327_v2  ;;  %s274_s7 = scalar_lea.vmem [#allocation9], %s1391_s8  ;;  %s1492_s9 = scalar_lea.hbm %s1544_s3, %s805_s24 }
  0x79   : > { %s658_s20 = sshll.u32 %s274_s7, 4  ;;  %s645_s22 = scalar_lea.sflag [#allocation5], %s1388_s21  ;;  %s1494_s20 = int_to_ptr.vmem [resolvable:$true] %s658_s20 }
  0x7a   : > { %s1082_s28 = scalar_lea.vmem %s1494_s20, 64  ;;  %p1567_p10 = scmp.ne.s32.totalorder %s1555_s25, 0 }
  0x7b   : > { %p1083_p4 = scmp.ne.s32.totalorder %s1494_s20, %s1082_s28  ;;  %s1175_s15 = smov [#allocation9]  }
  0x7c   : > { %s1086_s30 = sshll.u32 %s1175_s15, 4  ;;  %s1087_s30 = int_to_ptr.vmem [resolvable:$false] %s1086_s30 }
  0x7d   : > { %p1084_p12 = pnand %p1083_p4, %p1567_p10  ;;  %s1088_s1 = scalar_lea.vmem %s1087_s30, 128 }
  0x7e   : > { %p1089_p8 = scmp.lt.s32.totalorder %s1494_s20, %s1087_s30  ;;  %p1090_p9 = scmp.lt.s32.totalorder %s1088_s1, %s1082_s28 }
  0x7f   : > { %p1085_p1 = pneg %p1084_p12 }
  0x80   : > { %p1091_p6 = por %p1090_p9, %p1089_p8 }
  0x82   : > { %p1092_p13 = pnand %p1091_p6, %p1085_p1 }
  0xdd   : > { %v292_v3 = vpop.trf.xlu0 }
  0xde   : > { %828 = vmatprep.mubr.msk.bf16.mxu0 %vm300_vm1, %v292_v3 }
  0xe1   : > { %v293_v4 = vpop.trf.xlu0 }
  0xe2   : > { %829 = vmatmul.mubr.msk.bf16.vlgmr.msra.gmra.mrb[0].mxu0 %vm300_vm1, %v293_v4 }
  0xe5   : > { %v294_v5 = vpop.trf.xlu0 }
  0xe6   : > { %832 = vmatprep.mubr.msk.bf16.mxu0 %vm300_vm1, %v294_v5 }
  0xe9   : > { %v295_v6 = vpop.trf.xlu0 }
  0xea   : > { %833 = vmatmul.mubr.msk.bf16.gmra.mrb[4].mxu0 %vm300_vm1, %v295_v6 }
  0xed   : > { %v296_v7 = vpop.trf.xlu0 }
  0xee   : > { %836 = vmatprep.mubr.msk.bf16.mxu0 %vm300_vm1, %v296_v7 }
  0xf1   : > { %v297_v8 = vpop.trf.xlu0 }
  0xf2   : > { %837 = vmatmul.mubr.msk.bf16.gmra.mrb[8].mxu0 %vm300_vm1, %v297_v8 }
  0xf5   : > { %v298_v9 = vpop.trf.xlu0 }
  0xf6   : > { %840 = vmatprep.mubr.msk.bf16.mxu0 %vm300_vm1, %v298_v9 }
  0xf9   : > { %v299_v10 = vpop.trf.xlu0 }
  0xfa   : > { %841 = vmatmul.mubr.msk.bf16.gmra.mrb[12].mxu0 %vm300_vm1, %v299_v10 }
 0x1b5   : > { %v830_v11 = vpop.f32.mrb[0].mxu0 }
 0x1b6   : > { %430 = vmax.xlane.f32.xlu1 %v830_v11  ;;  %v363_v12 = vpop.f32.mrb[1].mxu0 }
 0x1b7   : > { %426 = vmax.xlane.f32.xlu0 %v363_v12  ;;  %v831_v13 = vpop.f32.mrb[2].mxu0 }
 0x1b8   : > { %v366_v14 = vpop.f32.mrb[3].mxu0 }
 0x1ba   : > { %432 = vmax.xlane.f32.xlu1 %v831_v13 }
 0x1bd   : > { %v834_v15 = vpop.f32.mrb[4].mxu0 }
 0x1be   : > { %428 = vmax.xlane.f32.xlu1 %v366_v14  ;;  %v379_v16 = vpop.f32.mrb[5].mxu0 }
 0x1bf   : > { %v835_v17 = vpop.f32.mrb[6].mxu0 }
 0x1c0   : > { %v382_v18 = vpop.f32.mrb[7].mxu0 }
 0x1c2   : > { %438 = vmax.xlane.f32.xlu1 %v834_v15 }
 0x1c5   : > { %v1413_v19 = vpop.f32.mrb[8].mxu0 }
 0x1c6   : > { %434 = vmax.xlane.f32.xlu1 %v379_v16  ;;  %v395_v20 = vpop.f32.mrb[9].mxu0 }
 0x1c7   : > { %v1415_v21 = vpop.f32.mrb[10].mxu0 }
 0x1c8   : > { %v398_v22 = vpop.f32.mrb[11].mxu0 }
 0x1ca   : > { %440 = vmax.xlane.f32.xlu1 %v835_v17 }
 0x1cd   : > { %v1417_v23 = vpop.f32.mrb[12].mxu0 }
 0x1ce   : > { %436 = vmax.xlane.f32.xlu1 %v382_v18  ;;  %v1419_v24 = vpop.f32.mrb[13].mxu0 }
 0x1cf   : > { %v1421_v25 = vpop.f32.mrb[14].mxu0 }
 0x1d0   : > { %v1423_v26 = vpop.f32.mrb[15].mxu0 }
 0x1d1   : > { %452 = vmax.xlane.f32.xlu0 %v1423_v26 }
 0x1d2   : > { %446 = vmax.xlane.f32.xlu1 %v1413_v19 }
 0x1d5   : > { %456 = vmax.xlane.f32.xlu0 %v1421_v25 }
 0x1d6   : > { %442 = vmax.xlane.f32.xlu1 %v395_v20 }
 0x1da   : > { %444 = vmax.xlane.f32.xlu1 %v398_v22 }
 0x1de   : > { %448 = vmax.xlane.f32.xlu1 %v1415_v21 }
 0x1e2   : > { %450 = vmax.xlane.f32.xlu1 %v1419_v24 }
 0x1e6   : > { %454 = vmax.xlane.f32.xlu1 %v1417_v23 }
 0x243   : > { %v431_v27 = vpop.xlane.xlu1 %430 }
 0x244   : > { %v460_v29 = vsub.f32 %v830_v11, %v431_v27  ;;  %v427_v31 = vpop.xlane.xlu0 %426 }
 0x245   : > { %v458_v34 = vsub.f32 %v363_v12, %v427_v31 }
 0x247   : > { %v433_v28 = vpop.xlane.xlu1 %432 }
 0x248   : > { %v461_v30 = vsub.f32 %v831_v13, %v433_v28 }
 0x24a   : > { %v475_v32 = vpack.c.bf16 %v461_v30, %v460_v29 }
 0x24b   : > { %v429_v33 = vpop.xlane.xlu1 %428 }
 0x24c   : > { %v459_v35 = vsub.f32 %v366_v14, %v429_v33  ;;  %v486_v38 = vmul.bf16 1069105081, %v475_v32 }
 0x24e   : > { %v474_v36 = vpack.c.bf16 %v459_v35, %v458_v34 }
 0x24f   : > { %v439_v37 = vpop.xlane.xlu1 %438 }
 0x250   : > { %v483_v39 = vmul.bf16 1069105081, %v474_v36  ;;  %v464_v42 = vsub.f32 %v834_v15, %v439_v37 }
 0x252   : > { %940 = vpow.bf16 %v483_v39 }
 0x253   : > { %v435_v40 = vpop.xlane.xlu1 %434  ;;  %942 = vpow.bf16 %v486_v38 }
 0x254   : > { %v462_v46 = vsub.f32 %v379_v16, %v435_v40 }
 0x257   : > { %v441_v41 = vpop.xlane.xlu1 %440 }
 0x258   : > { %v465_v43 = vsub.f32 %v835_v17, %v441_v41 }
 0x25a   : > { %v477_v44 = vpack.c.bf16 %v465_v43, %v464_v42 }
 0x25b   : > { %v437_v45 = vpop.xlane.xlu1 %436 }
 0x25c   : > { %v463_v47 = vsub.f32 %v382_v18, %v437_v45  ;;  %v492_v54 = vmul.bf16 1069105081, %v477_v44 }
 0x25d   : > { %v1431_v48 = vpop.eup %940 }
 0x25e   : > { %v476_v49 = vpack.c.bf16 %v463_v47, %v462_v46  ;;  %v507_v50 = vunpack.c.h.bf16 %v1431_v48  ;;  %v506_v51 = vunpack.c.l.bf16 %v1431_v48  ;;  %v1435_v52 = vpop.eup %942  ;;  %v453_v63 = vpop.xlane.xlu0 %452 }
 0x25f   : > { %v447_v53 = vpop.xlane.xlu1 %446  ;;  %v509_v56 = vunpack.c.h.bf16 %v1435_v52  ;;  %v508_v57 = vunpack.c.l.bf16 %v1435_v52  ;;  %v471_v10 = vsub.f32 %v1423_v26, %v453_v63 }
 0x260   : > { %v489_v55 = vmul.bf16 1069105081, %v476_v49  ;;  %524 = vadd.xlane.f32.xlu0 %v507_v50  ;;  %522 = vadd.xlane.f32.xlu1 %v506_v51  ;;  %v468_v1 = vsub.f32 %v1413_v19, %v447_v53 }
 0x262   : > { %944 = vpow.bf16 %v489_v55  ;;  %v457_v13 = vpop.xlane.xlu0 %456 }
 0x263   : > { %v443_v58 = vpop.xlane.xlu1 %442  ;;  %946 = vpow.bf16 %v492_v54  ;;  %v473_v18 = vsub.f32 %v1421_v25, %v457_v13 }
 0x264   : > { %528 = vadd.xlane.f32.xlu0 %v509_v56  ;;  %526 = vadd.xlane.f32.xlu1 %v508_v57  ;;  %v466_v60 = vsub.f32 %v395_v20, %v443_v58 }
 0x267   : > { %v445_v59 = vpop.xlane.xlu1 %444 }
 0x268   : > { %v467_v61 = vsub.f32 %v398_v22, %v445_v59 }
 0x26a   : > { %v478_v62 = vpack.c.bf16 %v467_v61, %v466_v60 }
 0x26b   : > { %v449_v0 = vpop.xlane.xlu1 %448 }
 0x26c   : > { %v495_v2 = vmul.bf16 1069105081, %v478_v62  ;;  %v469_v3 = vsub.f32 %v1415_v21, %v449_v0  ;;  %v1173_v21 = vmov 0.0  }
 0x26d   : > { %v1441_v4 = vpop.eup %944  ;;  %844 = vmatprep.subr.bf16.mxu1 %v1173_v21  ;;  %860 = vmatprep.mubr.msk.bf16.mxu1 %vm1174_vm2, %v1173_v21 }
 0x26e   : > { %948 = vpow.bf16 %v495_v2  ;;  %v479_v5 = vpack.c.bf16 %v469_v3, %v468_v1  ;;  %v511_v6 = vunpack.c.h.bf16 %v1441_v4  ;;  %v510_v7 = vunpack.c.l.bf16 %v1441_v4  ;;  %v1445_v8 = vpop.eup %946 }
 0x26f   : > { %v451_v9 = vpop.xlane.xlu1 %450  ;;  %v513_v15 = vunpack.c.h.bf16 %v1445_v8  ;;  %v512_v16 = vunpack.c.l.bf16 %v1445_v8 }
 0x270   : > { %v498_v11 = vmul.bf16 1069105081, %v479_v5  ;;  %v470_v12 = vsub.f32 %v1419_v24, %v451_v9  ;;  %532 = vadd.xlane.f32.xlu0 %v511_v6  ;;  %530 = vadd.xlane.f32.xlu1 %v510_v7 }
 0x272   : > { %950 = vpow.bf16 %v498_v11  ;;  %v480_v14 = vpack.c.bf16 %v471_v10, %v470_v12 }
 0x273   : > { %v455_v17 = vpop.xlane.xlu1 %454 }
 0x274   : > { %v501_v19 = vmul.bf16 1069105081, %v480_v14  ;;  %v472_v20 = vsub.f32 %v1417_v23, %v455_v17  ;;  %536 = vadd.xlane.f32.xlu0 %v513_v15  ;;  %534 = vadd.xlane.f32.xlu1 %v512_v16 }
 0x276   : > { %952 = vpow.bf16 %v501_v19  ;;  %v481_v22 = vpack.c.bf16 %v473_v18, %v472_v20  ;;  %v283_v20 = vld [vmem:[%s242_s18] sm:$0xf] }
 0x278   : > { %v504_v24 = vmul.bf16 1069105081, %v481_v22 }
 0x279   : > { %v1454_v26 = vpop.eup %948 }
 0x27a   : > { %954 = vpow.bf16 %v504_v24  ;;  %v515_v27 = vunpack.c.h.bf16 %v1454_v26  ;;  %v514_v28 = vunpack.c.l.bf16 %v1454_v26 }
 0x27c   : > { %540 = vadd.xlane.f32.xlu0 %v515_v27  ;;  %538 = vadd.xlane.f32.xlu1 %v514_v28 }
 0x27d   : > { %v1458_v25 = vpop.eup %950 }
 0x27e   : > { %v517_v23 = vunpack.c.h.bf16 %v1458_v25  ;;  %v516_v29 = vunpack.c.l.bf16 %v1458_v25 }
 0x280   : > { %544 = vadd.xlane.f32.xlu0 %v517_v23  ;;  %542 = vadd.xlane.f32.xlu1 %v516_v29 }
 0x281   : > { %v1462_v30 = vpop.eup %952 }
 0x282   : > { %v519_v31 = vunpack.c.h.bf16 %v1462_v30  ;;  %v518_v32 = vunpack.c.l.bf16 %v1462_v30 }
 0x284   : > { %548 = vadd.xlane.f32.xlu0 %v519_v31  ;;  %546 = vadd.xlane.f32.xlu1 %v518_v32 }
 0x285   : > { %v1466_v33 = vpop.eup %954 }
 0x286   : > { %v521_v34 = vunpack.c.h.bf16 %v1466_v33  ;;  %v520_v35 = vunpack.c.l.bf16 %v1466_v33 }
 0x288   : > { %552 = vadd.xlane.f32.xlu0 %v521_v34  ;;  %550 = vadd.xlane.f32.xlu1 %v520_v35 }
 0x2ed   : > { %v523_v36 = vpop.xlane.xlu1 %522  ;;  %v525_v37 = vpop.xlane.xlu0 %524 }
 0x2ee   : > { %956 = vrcp.f32 %v523_v36 }
 0x2ef   : > { %958 = vrcp.f32 %v525_v37 }
 0x2f1   : > { %v527_v38 = vpop.xlane.xlu1 %526  ;;  %v529_v39 = vpop.xlane.xlu0 %528 }
 0x2f2   : > { %960 = vrcp.f32 %v527_v38 }
 0x2f3   : > { %962 = vrcp.f32 %v529_v39 }
 0x2f8   : > { %v957_v40 = vpop.eup %956 }
 0x2f9   : > { %v959_v41 = vpop.eup %958 }
 0x2fa   : > { %v570_v42 = vpack.c.bf16 %v959_v41, %v957_v40 }
 0x2fc   : > { %v961_v43 = vpop.eup %960  ;;  %v578_v44 = vmul.bf16 %v1431_v48, %v570_v42 }
 0x2fd   : > { %v963_v45 = vpop.eup %962  ;;  %v531_v46 = vpop.xlane.xlu1 %530 }
 0x2fe   : > { %v533_v47 = vpop.xlane.xlu0 %532  ;;  %964 = vrcp.f32 %v531_v46  ;;  %845 = vmatpush3.bf16.msra.mxu1 %v578_v44  ;;  %v571_v49 = vpack.c.bf16 %v963_v45, %v961_v43 }
 0x2ff   : > { %966 = vrcp.f32 %v533_v47  ;;  %846 = vmatprep.subr.bf16.mxu1 %v1173_v21 }
 0x300   : > { %v579_v50 = vmul.bf16 %v1435_v52, %v571_v49 }
 0x301   : > { %v535_v51 = vpop.xlane.xlu1 %534 }
 0x302   : > { %v537_v53 = vpop.xlane.xlu0 %536  ;;  %968 = vrcp.f32 %v535_v51  ;;  %847 = vmatpush3.bf16.msra.mxu1 %v579_v50 }
 0x303   : > { %970 = vrcp.f32 %v537_v53  ;;  %848 = vmatprep.subr.bf16.mxu1 %v1173_v21 }
 0x308   : > { %v965_v54 = vpop.eup %964 }
 0x309   : > { %v967_v48 = vpop.eup %966  ;;  %v539_v55 = vpop.xlane.xlu1 %538 }
 0x30a   : > { %v541_v56 = vpop.xlane.xlu0 %540  ;;  %972 = vrcp.f32 %v539_v55  ;;  %v572_v57 = vpack.c.bf16 %v967_v48, %v965_v54 }
 0x30b   : > { %974 = vrcp.f32 %v541_v56 }
 0x30c   : > { %v969_v58 = vpop.eup %968  ;;  %v580_v59 = vmul.bf16 %v1441_v4, %v572_v57 }
 0x30d   : > { %v971_v60 = vpop.eup %970  ;;  %v543_v61 = vpop.xlane.xlu1 %542 }
 0x30e   : > { %v545_v52 = vpop.xlane.xlu0 %544  ;;  %976 = vrcp.f32 %v543_v61  ;;  %849 = vmatpush3.bf16.msra.mxu1 %v580_v59  ;;  %v573_v62 = vpack.c.bf16 %v971_v60, %v969_v58 }
 0x30f   : > { %978 = vrcp.f32 %v545_v52  ;;  %850 = vmatprep.subr.bf16.mxu1 %v1173_v21 }
 0x310   : > { %v581_v63 = vmul.bf16 %v1445_v8, %v573_v62 }
 0x311   : > { %v547_v0 = vpop.xlane.xlu1 %546 }
 0x312   : > { %v549_v1 = vpop.xlane.xlu0 %548  ;;  %980 = vrcp.f32 %v547_v0  ;;  %851 = vmatpush3.bf16.msra.mxu1 %v581_v63 }
 0x313   : > { %982 = vrcp.f32 %v549_v1  ;;  %852 = vmatprep.subr.bf16.mxu1 %v1173_v21 }
 0x314   : > { %v973_v2 = vpop.eup %972 }
 0x315   : > { %v975_v3 = vpop.eup %974  ;;  %v551_v4 = vpop.xlane.xlu1 %550 }
 0x316   : > { %v553_v5 = vpop.xlane.xlu0 %552  ;;  %984 = vrcp.f32 %v551_v4  ;;  %v574_v6 = vpack.c.bf16 %v975_v3, %v973_v2 }
 0x317   : > { %986 = vrcp.f32 %v553_v5 }
 0x318   : > { %v977_v7 = vpop.eup %976  ;;  %v582_v9 = vmul.bf16 %v1454_v26, %v574_v6 }
 0x319   : > { %v979_v10 = vpop.eup %978 }
 0x31a   : > { %853 = vmatpush3.bf16.msra.mxu1 %v582_v9  ;;  %v575_v8 = vpack.c.bf16 %v979_v10, %v977_v7 }
 0x31b   : > { %854 = vmatprep.subr.bf16.mxu1 %v1173_v21 }
 0x31c   : > { %v981_v11 = vpop.eup %980  ;;  %v583_v12 = vmul.bf16 %v1458_v25, %v575_v8 }
 0x31d   : > { %v983_v13 = vpop.eup %982 }
 0x31e   : > { %855 = vmatpush3.bf16.msra.mxu1 %v583_v12  ;;  %v576_v14 = vpack.c.bf16 %v983_v13, %v981_v11 }
 0x31f   : > { %856 = vmatprep.subr.bf16.mxu1 %v1173_v21 }
 0x320   : > { %v985_v15 = vpop.eup %984  ;;  %v584_v16 = vmul.bf16 %v1462_v30, %v576_v14 }
 0x321   : > { %v987_v17 = vpop.eup %986 }
 0x322   : > { %857 = vmatpush3.bf16.msra.mxu1 %v584_v16  ;;  %v577_v18 = vpack.c.bf16 %v987_v17, %v985_v15 }
 0x323   : > { %858 = vmatprep.subr.bf16.mxu1 %v1173_v21 }
 0x324   : > { %v585_v19 = vmul.bf16 %v1466_v33, %v577_v18 }
 0x326   : > { %859 = vmatpush3.bf16.msra.mxu1 %v585_v19 }
 0x329   : > { %861 = vmatmul.mubr.bf16.vlgmr.msra.gmra.mrb[0].mxu1 %v283_v20 }
 0x3fc   : > { %v621_v22 = vpop.f32.mrb[0].mxu1 }
 0x3fd   : > { %633 = vmax.xlane.f32.xlu1 %v621_v22  ;;  %v862_v24 = vpop.f32.mrb[1].mxu1 }
 0x3fe   : > { %v624_v26 = vpop.f32.mrb[2].mxu1 }
 0x3ff   : > { %v863_v27 = vpop.f32.mrb[3].mxu1 }
 0x48a   : > { %v634_v28 = vpop.xlane.xlu1 %633 }
 0x48b   : > { %v635_v25 = vsub.f32 %v621_v22, %v634_v28 }
 0x48d   : > { %v636_v23 = vmul.f32 1.442695, %v635_v25 }
 0x48f   : > { %988 = vpow2.f32 %v636_v23 }
 0x499   : > { %v989_v29 = vpop.eup %988 }
 0x49a   : > { %638 = vadd.xlane.f32.xlu0 %v989_v29 }
 0x527   : > { %v639_v21 = vpop.xlane.xlu0 %638 }
 0x528   : > { %990 = vrcp.f32 %v639_v21 }
 0x532   : > { %v991_v30 = vpop.eup %990 }
 0x533   : > { %v641_v31 = vmul.f32 %v991_v30, %v989_v29 }
 0x535   : > { %v642_v32 = vpack.c.bf16 %v641_v31, %v641_v31 }
 0x537   : > { %643 = vst [vmem:[%s274_s7] sm:$0xf] %v642_v32 }
 0x538   : > { %1095 = shalt.err (!%p1092_p13)
}
 0x539   : > { %s1096_s29 = scalar_lea.hbm %s1492_s9, 64  ;;  %s1100_s21 = scalar_lea.hbm %s1544_s3, 128 }
 0x53a   : > { %p1097_p11 = scmp.ne.s32.totalorder %s1492_s9, %s1096_s29  ;;  %p1101_p7 = scmp.lt.u32.totalorder %s1492_s9, %s1544_s3 }
 0x53b   : > { %p1102_p3 = scmp.lt.u32.totalorder %s1100_s21, %s1096_s29  ;;  %p1104_p4 = scmp.lt.u32.totalorder %s1096_s29, %s1492_s9 }
 0x53c   : > { %p1098_p2 = pnand %p1097_p11, %p1567_p10 }
 0x53d   : > { %p1103_p0 = por %p1102_p3, %p1101_p7 }
 0x53e   : > { %p1099_p5 = pneg %p1098_p2 }
 0x53f   : > { %p1105_p12 = por %p1104_p4, %p1103_p0 }
 0x541   : > { %p1106_p1 = pnand %p1105_p12, %p1099_p5 }
 0x543   : > { %1109 = shalt.err (!%p1106_p1)
}
 0x544   : > { %871 = dma.vmem_to_hbm [thread:$0]  (%p1567_p10), %s1494_s20, 64, %s1492_s9, %s645_s22  }
 0x545 PF: > { %s670_s16 = sand.u32 1, %s1148_s12   ;;  %p1568_p8 = scmp.ne.s32.totalorder %s1557_s27, 0 }
 0x546   : > { %p1569_p9 = scmp.ge.s32.totalorder %s1168_s17, 2  ;;  %s671_s4 = scalar_lea.sflag [#allocation5], %s670_s16 }
 0x548   : > { %p884_p6 = pnand %p1569_p9, %p1568_p8 }
 0x54a   : > { %1143 = dma.done.wait (!%p884_p6), %s671_s4, 64  }
 0x54b   : > { %1145 = vsyncadd (!%p884_p6), %s671_s4, 4294967232  ;;  %s22_s17 = sadd.s32 1, %s1168_s17   ;;  %s1570_s25 = sld [smem:[#allocation15_spill]] }
 0x54c   : > { %p19_p13 = scmp.ge.s32.totalorder %s22_s17, 4   ;;  %s1571_s15 = sld [smem:[#allocation13_spill]] }
 0x54d   : > { %s1572_s16 = sld [smem:[#allocation14_spill]]  ;;  %s1573_s12 = smov %s1152_s13 }
 0x54e   : > { %s1574_s13 = smov %s1156_s14  ;;  %21 = sbr.rel (!%p19_p13) target bundleno = 10 (0xa), region = 109 }
 0x551   : > { %s1575_s14 = smov %s1570_s25 }
 0x555   :  { %676 = vsyncpa [#allocation4], 1 }
 0x556   :  { %678 = vsyncpa [#allocation4 + $0x1], 1 }
 0x557   :  { %679 = vsyncpa [#allocation7], 1 }
 0x558   :  { %681 = vsyncpa [#allocation7 + $0x1], 1 }
 0x559   :  { %682 = vsyncpa [#allocation5], 1 }
 0x55a   :  { %684 = vsyncpa [#allocation5 + $0x1], 1 }

// kernel: bad_transformer_unit.10
= control target key start
LH: loop header
LB: loop body
LE: loop exit
PB: predicated region body
PF: predicated region fallthrough
CT: control target
= control target key end

     0   :  { %8 = vsyncpa [#allocation4], 0  ;;  %s492_s0 = inlined_call_operand.hbm [shape: bf16[16,128], index: 0, kind: input, shape index: {}]   ;;  %s493_s1 = inlined_call_operand.hbm [shape: bf16[16,128], index: 1, kind: input, shape index: {}]   ;;  %s494_s2 = inlined_call_operand.hbm [shape: bf16[128,128], index: 2, kind: input, shape index: {}]   ;;  %s495_s3 = inlined_call_operand.hbm [shape: bf16[16,128], index: 3, kind: output, shape index: {}]  }
   0x1   :  { %9 = vsyncpa [#allocation7], 0 }
   0x2   :  { %10 = vsyncpa [#allocation5], 0  ;;  %s397_s12 = smov [#allocation6]   ;;  %s398_s14 = smov [#allocation3]  }
   0x3   :  { %s28_s13 = sshll.u32 %s397_s12, 4  ;;  %s16_s15 = sshll.u32 %s398_s14, 4  ;;  %s29_s13 = int_to_ptr.vmem [resolvable:$true] %s28_s13  ;;  %s425_s15 = int_to_ptr.vmem [resolvable:$true] %s16_s15 }
   0x4   :  { %s303_s18 = scalar_lea.hbm %s493_s1, 128 }
   0x5   :  { %p304_p0 = scmp.ne.s32.totalorder %s493_s1, %s303_s18  ;;  %p307_p1 = scmp.lt.u32.totalorder %s303_s18, %s493_s1 }
   0x7   :  { %p309_p2 = pnand %p307_p1, %p304_p0 }
   0x9   :  { %312 = shalt.err (!%p309_p2)
}
   0xa   :  { %s313_s23 = scalar_lea.vmem %s29_s13, 128  ;;  %p318_p4 = scmp.lt.s32.totalorder %s29_s13, %s29_s13 }
   0xb   :  { %p314_p3 = scmp.ne.s32.totalorder %s29_s13, %s313_s23  ;;  %p319_p5 = scmp.lt.s32.totalorder %s313_s23, %s313_s23 }
   0xd   :  { %p320_p6 = por %p319_p5, %p318_p4 }
   0xf   :  { %p321_p7 = pnand %p320_p6, %p314_p3 }
  0x11   :  { %324 = shalt.err (!%p321_p7)
}
  0x12   :  { %s399_s24 = smov 64   ;;  %s400_s25 = smov 4  }
  0x13   :  { %34 = dma.hbm_to_vmem [thread:$0]  %s493_s1, 128, %s29_s13, [#allocation7], %s399_s24, %s399_s24, %s400_s25  }
  0x14   :  { %s325_s30 = scalar_lea.hbm %s492_s0, 128 }
  0x15   :  { %p326_p8 = scmp.ne.s32.totalorder %s492_s0, %s325_s30  ;;  %p329_p9 = scmp.lt.u32.totalorder %s325_s30, %s492_s0 }
  0x17   :  { %p331_p10 = pnand %p329_p9, %p326_p8 }
  0x19   :  { %334 = shalt.err (!%p331_p10)
}
  0x1a   :  { %s335_s8 = scalar_lea.vmem %s425_s15, 128  ;;  %p340_p12 = scmp.lt.s32.totalorder %s425_s15, %s425_s15 }
  0x1b   :  { %p336_p11 = scmp.ne.s32.totalorder %s425_s15, %s335_s8  ;;  %p341_p13 = scmp.lt.s32.totalorder %s335_s8, %s335_s8 }
  0x1d   :  { %p342_p0 = por %p341_p13, %p340_p12 }
  0x1f   :  { %p343_p1 = pnand %p342_p0, %p336_p11 }
  0x21   :  { %346 = shalt.err (!%p343_p1)
}
  0x22   :  { %22 = dma.hbm_to_vmem [thread:$0]  %s492_s0, 128, %s425_s15, [#allocation4], %s399_s24, %s399_s24, %s400_s25  }
  0x23   :  { %s401_s10 = smov [#allocation8]   ;;  %s347_s14 = scalar_lea.hbm %s494_s2, 1024 }
  0x24   :  { %s40_s11 = sshll.u32 %s401_s10, 4  ;;  %p348_p2 = scmp.ne.s32.totalorder %s494_s2, %s347_s14  ;;  %s41_s11 = int_to_ptr.vmem [resolvable:$true] %s40_s11 }
  0x25   :  { %p351_p3 = scmp.lt.u32.totalorder %s347_s14, %s494_s2 }
  0x27   :  { %p353_p4 = pnand %p351_p3, %p348_p2 }
  0x29   :  { %356 = shalt.err (!%p353_p4)
}
  0x2a   :  { %s357_s20 = scalar_lea.vmem %s41_s11, 1024  ;;  %p362_p6 = scmp.lt.s32.totalorder %s41_s11, %s41_s11 }
  0x2b   :  { %p358_p5 = scmp.ne.s32.totalorder %s41_s11, %s357_s20  ;;  %p363_p7 = scmp.lt.s32.totalorder %s357_s20, %s357_s20 }
  0x2d   :  { %p364_p8 = por %p363_p7, %p362_p6 }
  0x2f   :  { %p365_p9 = pnand %p364_p8, %p358_p5 }
  0x31   :  { %368 = shalt.err (!%p365_p9)
}
  0x32   :  { %46 = dma.hbm_to_vmem [thread:$0]  %s494_s2, 1024, %s41_s11, [#allocation7], %s399_s24, %s399_s24, %s400_s25  }
  0x33   :  { %391 = dma.done.wait [#allocation4], 128  }
  0x34   :  { %392 = vsyncadd [#allocation4], 4294967168 }
  0x35   :  { %393 = dma.done.wait [#allocation7], 1152  }
  0x36   :  { %394 = vsyncadd [#allocation7], 4294966144  ;;  %v402_v0 = vmov 0.0   ;;  %vm403_vm0 = vmmov 0   ;;  %v290_v1 = vld [vmem:[#allocation8] sm:$0xff]   ;;  %v291_v2 = vld [vmem:[#allocation8 + $0x8] sm:$0xff]  }
  0x37   :  { %262 = vmatprep.subr.bf16.mxu0 %v402_v0  ;;  %278 = vmatprep.mubr.msk.bf16.mxu0 %vm403_vm0, %v402_v0  ;;  %v292_v3 = vld [vmem:[#allocation8 + $0x10] sm:$0xff]   ;;  %v293_v4 = vld [vmem:[#allocation8 + $0x18] sm:$0xff]   ;;  %v294_v5 = vld [vmem:[#allocation8 + $0x20] sm:$0xff]   ;;  %s404_s2 = smov [#allocation9]  }
  0x38   :  { %263 = vmatpush3.bf16.msra.mxu0 %v290_v1  ;;  %v295_v6 = vld [vmem:[#allocation8 + $0x28] sm:$0xff]   ;;  %v296_v7 = vld [vmem:[#allocation8 + $0x30] sm:$0xff]   ;;  %v297_v8 = vld [vmem:[#allocation8 + $0x38] sm:$0xff]   ;;  %s218_s21 = sshll.u32 %s404_s2, 4  ;;  %s219_s21 = int_to_ptr.vmem [resolvable:$true] %s218_s21 }
  0x39   :  { %264 = vmatprep.subr.bf16.mxu0 %v402_v0  ;;  %v298_v9 = vld [vmem:[#allocation3] sm:$0xff]   ;;  %v245_v19 = vld [vmem:[#allocation6] sm:$0xff]   ;;  %s369_s22 = scalar_lea.vmem %s219_s21, 128  ;;  %p374_p11 = scmp.lt.s32.totalorder %s219_s21, %s219_s21 }
  0x3a   :  { %v246_v22 = vunpack.c.l.bf16 %v245_v19  ;;  %v247_v25 = vunpack.c.h.bf16 %v245_v19  ;;  %p370_p10 = scmp.ne.s32.totalorder %s219_s21, %s369_s22  ;;  %p375_p12 = scmp.lt.s32.totalorder %s369_s22, %s369_s22 }
  0x3c   :  { %265 = vmatpush3.bf16.msra.mxu0 %v291_v2  ;;  %p376_p13 = por %p375_p12, %p374_p11 }
  0x3d   :  { %266 = vmatprep.subr.bf16.mxu0 %v402_v0 }
  0x3e   :  { %p377_p0 = pnand %p376_p13, %p370_p10 }
  0x40   :  { %267 = vmatpush3.bf16.msra.mxu0 %v292_v3 }
  0x41   :  { %268 = vmatprep.subr.bf16.mxu0 %v402_v0 }
  0x44   :  { %269 = vmatpush3.bf16.msra.mxu0 %v293_v4 }
  0x45   :  { %270 = vmatprep.subr.bf16.mxu0 %v402_v0 }
  0x48   :  { %271 = vmatpush3.bf16.msra.mxu0 %v294_v5 }
  0x49   :  { %272 = vmatprep.subr.bf16.mxu0 %v402_v0 }
  0x4c   :  { %273 = vmatpush3.bf16.msra.mxu0 %v295_v6 }
  0x4d   :  { %274 = vmatprep.subr.bf16.mxu0 %v402_v0 }
  0x50   :  { %275 = vmatpush3.bf16.msra.mxu0 %v296_v7 }
  0x51   :  { %276 = vmatprep.subr.bf16.mxu0 %v402_v0 }
  0x54   :  { %277 = vmatpush3.bf16.msra.mxu0 %v297_v8 }
  0x57   :  { %279 = vmatmul.mubr.bf16.vlgmr.msra.gmra.mrb[0].mxu0 %v298_v9 }
 0x12a   :  { %v171_v10 = vpop.f32.mrb[0].mxu0 }
 0x12b   :  { %v187_v11 = vmul.f32 0.5, %v171_v10  ;;  %v280_v12 = vpop.f32.mrb[1].mxu0 }
 0x12c   :  { %v174_v13 = vpop.f32.mrb[2].mxu0 }
 0x12d   :  { %299 = vtanh.f32 %v187_v11  ;;  %v188_v14 = vmul.f32 0.5, %v174_v13  ;;  %v281_v15 = vpop.f32.mrb[3].mxu0 }
 0x12f   :  { %301 = vtanh.f32 %v188_v14 }
 0x137   :  { %v300_v16 = vpop.eup %299 }
 0x138   :  { %v191_v17 = vadd.f32 1.0, %v300_v16 }
 0x139   :  { %v302_v18 = vpop.eup %301 }
 0x13a   :  { %v193_v20 = vmul.f32 0.5, %v191_v17  ;;  %v192_v21 = vadd.f32 1.0, %v302_v18 }
 0x13c   :  { %v199_v23 = vmul.f32 %v193_v20, %v171_v10  ;;  %v194_v24 = vmul.f32 0.5, %v192_v21 }
 0x13e   :  { %v200_v26 = vmul.f32 %v194_v24, %v174_v13  ;;  %v201_v27 = vadd.f32 %v246_v22, %v199_v23 }
 0x140   :  { %v202_v28 = vadd.f32 %v247_v25, %v200_v26 }
 0x142   :  { %v251_v29 = vpack.c.bf16 %v202_v28, %v201_v27 }
 0x144   :  { %252 = vst [vmem:[#allocation9] sm:$0xff] %v251_v29  }
 0x145   :  { %380 = shalt.err (!%p377_p0)
}
 0x146   :  { %s381_s27 = scalar_lea.hbm %s495_s3, 128 }
 0x147   :  { %p382_p1 = scmp.ne.s32.totalorder %s495_s3, %s381_s27  ;;  %p385_p2 = scmp.lt.u32.totalorder %s381_s27, %s495_s3 }
 0x149   :  { %p387_p3 = pnand %p385_p2, %p382_p1 }
 0x14b   :  { %390 = shalt.err (!%p387_p3)
}
 0x14c   :  { %224 = dma.vmem_to_hbm [thread:$0]  %s219_s21, 128, %s495_s3, [#allocation5], %s399_s24, %s399_s24, %s400_s25  }
 0x14d   :  { %395 = dma.done.wait [#allocation5], 128  }
 0x14e   :  { %396 = vsyncadd [#allocation5], 4294967168 }
 0x14f   :  { %228 = vsyncpa [#allocation4], 1 }
 0x150   :  { %229 = vsyncpa [#allocation7], 1 }
 0x151   :  { %230 = vsyncpa [#allocation5], 1 }

// kernel: bad_transformer_unit.8
= control target key start
LH: loop header
LB: loop body
LE: loop exit
PB: predicated region body
PF: predicated region fallthrough
CT: control target
= control target key end

     0   :  { %12 = vsyncpa [#allocation6], 0  ;;  %s1052_s0 = inlined_call_operand.hbm [shape: bf16[16,128], index: 0, kind: input, shape index: {}]   ;;  %s1053_s1 = inlined_call_operand.hbm [shape: bf16[128,128], index: 1, kind: input, shape index: {}]   ;;  %s1054_s2 = inlined_call_operand.hbm [shape: bf16[128,128], index: 2, kind: input, shape index: {}]   ;;  %s1055_s3 = inlined_call_operand.hbm [shape: bf16[128,128], index: 3, kind: input, shape index: {}]   ;;  %s1056_s4 = inlined_call_operand.hbm [shape: bf16[16,128], index: 4, kind: output, shape index: {0}]   ;;  %s1057_s5 = inlined_call_operand.hbm [shape: bf16[16,128], index: 5, kind: output, shape index: {1}]   ;;  %s1058_s6 = inlined_call_operand.hbm [shape: bf16[16,128], index: 6, kind: output, shape index: {2}]  }
   0x1   :  { %13 = vsyncpa [#allocation9], 0 }
   0x2   :  { %14 = vsyncpa [#allocation12], 0 }
   0x3   :  { %15 = vsyncpa [#allocation7], 0 }
   0x4   :  { %16 = vsyncpa [#allocation15], 0  ;;  %s857_s21 = smov [#allocation8]   ;;  %s858_s23 = smov [#allocation5]  }
   0x5   :  { %s34_s22 = sshll.u32 %s857_s21, 4  ;;  %s22_s24 = sshll.u32 %s858_s23, 4  ;;  %s35_s22 = int_to_ptr.vmem [resolvable:$true] %s34_s22  ;;  %s903_s24 = int_to_ptr.vmem [resolvable:$true] %s22_s24 }
   0x6   :  { %s693_s27 = scalar_lea.hbm %s1053_s1, 1024 }
   0x7   :  { %p694_p0 = scmp.ne.s32.totalorder %s1053_s1, %s693_s27  ;;  %p697_p1 = scmp.lt.u32.totalorder %s693_s27, %s1053_s1 }
   0x9   :  { %p699_p2 = pnand %p697_p1, %p694_p0 }
   0xb   :  { %702 = shalt.err (!%p699_p2)
}
   0xc   :  { %s703_s8 = scalar_lea.vmem %s35_s22, 1024  ;;  %p708_p4 = scmp.lt.s32.totalorder %s35_s22, %s35_s22 }
   0xd   :  { %p704_p3 = scmp.ne.s32.totalorder %s35_s22, %s703_s8  ;;  %p709_p5 = scmp.lt.s32.totalorder %s703_s8, %s703_s8 }
   0xf   :  { %p710_p6 = por %p709_p5, %p708_p4 }
  0x11   :  { %p711_p7 = pnand %p710_p6, %p704_p3 }
  0x13   :  { %714 = shalt.err (!%p711_p7)
}
  0x14   :  { %s859_s9 = smov 64   ;;  %s860_s10 = smov 4  }
  0x15   :  { %40 = dma.hbm_to_vmem [thread:$0]  %s1053_s1, 1024, %s35_s22, [#allocation9], %s859_s9, %s859_s9, %s860_s10  }
  0x16   :  { %s715_s15 = scalar_lea.hbm %s1052_s0, 128 }
  0x17   :  { %p716_p8 = scmp.ne.s32.totalorder %s1052_s0, %s715_s15  ;;  %p719_p9 = scmp.lt.u32.totalorder %s715_s15, %s1052_s0 }
  0x19   :  { %p721_p10 = pnand %p719_p9, %p716_p8 }
  0x1b   :  { %724 = shalt.err (!%p721_p10)
}
  0x1c   :  { %s725_s20 = scalar_lea.vmem %s903_s24, 128  ;;  %p730_p12 = scmp.lt.s32.totalorder %s903_s24, %s903_s24 }
  0x1d   :  { %p726_p11 = scmp.ne.s32.totalorder %s903_s24, %s725_s20  ;;  %p731_p13 = scmp.lt.s32.totalorder %s725_s20, %s725_s20 }
  0x1f   :  { %p732_p0 = por %p731_p13, %p730_p12 }
  0x21   :  { %p733_p1 = pnand %p732_p0, %p726_p11 }
  0x23   :  { %736 = shalt.err (!%p733_p1)
}
  0x24   :  { %28 = dma.hbm_to_vmem [thread:$0]  %s1052_s0, 128, %s903_s24, [#allocation6], %s859_s9, %s859_s9, %s860_s10  }
  0x25   :  { %s861_s22 = smov [#allocation10]   ;;  %s862_s25 = smov [#allocation11]  }
  0x26   :  { %s46_s23 = sshll.u32 %s861_s22, 4  ;;  %s58_s26 = sshll.u32 %s862_s25, 4  ;;  %s47_s23 = int_to_ptr.vmem [resolvable:$true] %s46_s23  ;;  %s940_s26 = int_to_ptr.vmem [resolvable:$true] %s58_s26 }
  0x27   :  { %s737_s29 = scalar_lea.hbm %s1054_s2, 1024 }
  0x28   :  { %p738_p2 = scmp.ne.s32.totalorder %s1054_s2, %s737_s29  ;;  %p741_p3 = scmp.lt.u32.totalorder %s737_s29, %s1054_s2 }
  0x2a   :  { %p743_p4 = pnand %p741_p3, %p738_p2 }
  0x2c   :  { %746 = shalt.err (!%p743_p4)
}
  0x2d   :  { %s747_s0 = scalar_lea.vmem %s47_s23, 1024  ;;  %p752_p6 = scmp.lt.s32.totalorder %s47_s23, %s47_s23 }
  0x2e   :  { %p748_p5 = scmp.ne.s32.totalorder %s47_s23, %s747_s0  ;;  %p753_p7 = scmp.lt.s32.totalorder %s747_s0, %s747_s0 }
  0x30   :  { %p754_p8 = por %p753_p7, %p752_p6 }
  0x32   :  { %p755_p9 = pnand %p754_p8, %p748_p5 }
  0x34   :  { %758 = shalt.err (!%p755_p9)
}
  0x35   :  { %52 = dma.hbm_to_vmem [thread:$0]  %s1054_s2, 1024, %s47_s23, [#allocation9], %s859_s9, %s859_s9, %s860_s10  }
  0x36   :  { %s759_s15 = scalar_lea.hbm %s1055_s3, 1024 }
  0x37   :  { %p760_p10 = scmp.ne.s32.totalorder %s1055_s3, %s759_s15  ;;  %p763_p11 = scmp.lt.u32.totalorder %s759_s15, %s1055_s3 }
  0x39   :  { %p765_p12 = pnand %p763_p11, %p760_p10 }
  0x3b   :  { %768 = shalt.err (!%p765_p12)
}
  0x3c   :  { %s769_s20 = scalar_lea.vmem %s940_s26, 1024  ;;  %p774_p0 = scmp.lt.s32.totalorder %s940_s26, %s940_s26 }
  0x3d   :  { %p770_p13 = scmp.ne.s32.totalorder %s940_s26, %s769_s20  ;;  %p775_p1 = scmp.lt.s32.totalorder %s769_s20, %s769_s20 }
  0x3f   :  { %p776_p2 = por %p775_p1, %p774_p0 }
  0x41   :  { %p777_p3 = pnand %p776_p2, %p770_p13 }
  0x43   :  { %780 = shalt.err (!%p777_p3)
}
  0x44   :  { %64 = dma.hbm_to_vmem [thread:$0]  %s1055_s3, 1024, %s940_s26, [#allocation12], %s859_s9, %s859_s9, %s860_s10  }
  0x45   :  { %847 = dma.done.wait [#allocation6], 128  }
  0x46   :  { %848 = vsyncadd [#allocation6], 4294967168 }
  0x47   :  { %849 = dma.done.wait [#allocation9], 2048  }
  0x48   :  { %850 = vsyncadd [#allocation9], 4294965248 }
  0x49   :  { %851 = dma.done.wait [#allocation12], 1024  }
  0x4a   :  { %852 = vsyncadd [#allocation12], 4294966272  ;;  %v863_v0 = vmov 0.0   ;;  %vm864_vm0 = vmmov 0   ;;  %v668_v1 = vld [vmem:[#allocation8] sm:$0xff]   ;;  %v669_v2 = vld [vmem:[#allocation8 + $0x8] sm:$0xff]  }
  0x4b   :  { %597 = vmatprep.subr.bf16.mxu0 %v863_v0  ;;  %617 = vmatprep.subr.bf16.mxu1 %v863_v0  ;;  %v670_v3 = vld [vmem:[#allocation8 + $0x10] sm:$0xff]   ;;  %v676_v4 = vld [vmem:[#allocation10] sm:$0xff]   ;;  %v671_v5 = vld [vmem:[#allocation8 + $0x18] sm:$0xff]   ;;  %s865_s3 = smov [#allocation13]  }
  0x4c   :  { %613 = vmatprep.mubr.msk.bf16.mxu0 %vm864_vm0, %v863_v0  ;;  %633 = vmatprep.mubr.msk.bf16.mxu1 %vm864_vm0, %v863_v0  ;;  %v678_v6 = vld [vmem:[#allocation10 + $0x8] sm:$0xff]   ;;  %v672_v7 = vld [vmem:[#allocation8 + $0x20] sm:$0xff]   ;;  %v680_v8 = vld [vmem:[#allocation10 + $0x10] sm:$0xff]   ;;  %s473_s21 = sshll.u32 %s865_s3, 4  ;;  %s474_s21 = int_to_ptr.vmem [resolvable:$true] %s473_s21 }
  0x4d   :  { %598 = vmatpush3.bf16.msra.mxu0 %v668_v1  ;;  %618 = vmatpush3.bf16.msra.mxu1 %v676_v4  ;;  %v673_v9 = vld [vmem:[#allocation8 + $0x28] sm:$0xff]   ;;  %v682_v10 = vld [vmem:[#allocation10 + $0x18] sm:$0xff]   ;;  %v674_v11 = vld [vmem:[#allocation8 + $0x30] sm:$0xff]   ;;  %s781_s22 = scalar_lea.vmem %s474_s21, 128  ;;  %p786_p5 = scmp.lt.s32.totalorder %s474_s21, %s474_s21 }
  0x4e   :  { %599 = vmatprep.subr.bf16.mxu0 %v863_v0  ;;  %619 = vmatprep.subr.bf16.mxu1 %v863_v0  ;;  %v684_v12 = vld [vmem:[#allocation10 + $0x20] sm:$0xff]   ;;  %v675_v13 = vld [vmem:[#allocation8 + $0x38] sm:$0xff]   ;;  %v686_v14 = vld [vmem:[#allocation10 + $0x28] sm:$0xff]   ;;  %p782_p4 = scmp.ne.s32.totalorder %s474_s21, %s781_s22  ;;  %p787_p6 = scmp.lt.s32.totalorder %s781_s22, %s781_s22 }
  0x4f   :  { %v677_v15 = vld [vmem:[#allocation5] sm:$0xff]   ;;  %v679_v16 = vld [vmem:[#allocation11] sm:$0xff]   ;;  %v688_v17 = vld [vmem:[#allocation10 + $0x30] sm:$0xff]  }
  0x50   :  { %v681_v18 = vld [vmem:[#allocation11 + $0x8] sm:$0xff]   ;;  %v690_v19 = vld [vmem:[#allocation10 + $0x38] sm:$0xff]   ;;  %v683_v20 = vld [vmem:[#allocation11 + $0x10] sm:$0xff]   ;;  %p788_p7 = por %p787_p6, %p786_p5 }
  0x51   :  { %600 = vmatpush3.bf16.msra.mxu0 %v669_v2  ;;  %620 = vmatpush3.bf16.msra.mxu1 %v678_v6  ;;  %v685_v21 = vld [vmem:[#allocation11 + $0x18] sm:$0xff]   ;;  %v687_v22 = vld [vmem:[#allocation11 + $0x20] sm:$0xff]   ;;  %v689_v23 = vld [vmem:[#allocation11 + $0x28] sm:$0xff]  }
  0x52   :  { %601 = vmatprep.subr.bf16.mxu0 %v863_v0  ;;  %621 = vmatprep.subr.bf16.mxu1 %v863_v0  ;;  %v691_v24 = vld [vmem:[#allocation11 + $0x30] sm:$0xff]   ;;  %v692_v25 = vld [vmem:[#allocation11 + $0x38] sm:$0xff]   ;;  %p789_p8 = pnand %p788_p7, %p782_p4 }
  0x55   :  { %602 = vmatpush3.bf16.msra.mxu0 %v670_v3  ;;  %622 = vmatpush3.bf16.msra.mxu1 %v680_v8 }
  0x56   :  { %603 = vmatprep.subr.bf16.mxu0 %v863_v0  ;;  %623 = vmatprep.subr.bf16.mxu1 %v863_v0 }
  0x59   :  { %604 = vmatpush3.bf16.msra.mxu0 %v671_v5  ;;  %624 = vmatpush3.bf16.msra.mxu1 %v682_v10 }
  0x5a   :  { %605 = vmatprep.subr.bf16.mxu0 %v863_v0  ;;  %625 = vmatprep.subr.bf16.mxu1 %v863_v0 }
  0x5d   :  { %606 = vmatpush3.bf16.msra.mxu0 %v672_v7  ;;  %626 = vmatpush3.bf16.msra.mxu1 %v684_v12 }
  0x5e   :  { %607 = vmatprep.subr.bf16.mxu0 %v863_v0  ;;  %627 = vmatprep.subr.bf16.mxu1 %v863_v0 }
  0x61   :  { %608 = vmatpush3.bf16.msra.mxu0 %v673_v9  ;;  %628 = vmatpush3.bf16.msra.mxu1 %v686_v14 }
  0x62   :  { %609 = vmatprep.subr.bf16.mxu0 %v863_v0  ;;  %629 = vmatprep.subr.bf16.mxu1 %v863_v0 }
  0x65   :  { %610 = vmatpush3.bf16.msra.mxu0 %v674_v11  ;;  %630 = vmatpush3.bf16.msra.mxu1 %v688_v17 }
  0x66   :  { %611 = vmatprep.subr.bf16.mxu0 %v863_v0  ;;  %631 = vmatprep.subr.bf16.mxu1 %v863_v0 }
  0x69   :  { %612 = vmatpush3.bf16.msra.mxu0 %v675_v13  ;;  %632 = vmatpush3.bf16.msra.mxu1 %v690_v19 }
  0x6a   :  { %637 = vmatprep.subr.bf16.mxu0 %v863_v0 }
  0x6c   :  { %614 = vmatmul.mubr.bf16.vlgmr.msra.gmra.mrb[0].mxu0 %v677_v15  ;;  %634 = vmatmul.mubr.bf16.vlgmr.msra.gmra.mrb[0].mxu1 %v677_v15 }
  0x6d   :  { %638 = vmatpush3.bf16.msra.mxu0 %v679_v16  ;;  %653 = vmatprep.mubr.msk.bf16.mxu0 %vm864_vm0, %v863_v0 }
  0x6e   :  { %639 = vmatprep.subr.bf16.mxu0 %v863_v0 }
  0x71   :  { %640 = vmatpush3.bf16.msra.mxu0 %v681_v18 }
  0x72   :  { %641 = vmatprep.subr.bf16.mxu0 %v863_v0 }
  0x75   :  { %642 = vmatpush3.bf16.msra.mxu0 %v683_v20 }
  0x76   :  { %643 = vmatprep.subr.bf16.mxu0 %v863_v0 }
  0x79   :  { %644 = vmatpush3.bf16.msra.mxu0 %v685_v21 }
  0x7a   :  { %645 = vmatprep.subr.bf16.mxu0 %v863_v0 }
  0x7d   :  { %646 = vmatpush3.bf16.msra.mxu0 %v687_v22 }
  0x7e   :  { %647 = vmatprep.subr.bf16.mxu0 %v863_v0 }
  0x81   :  { %648 = vmatpush3.bf16.msra.mxu0 %v689_v23 }
  0x82   :  { %649 = vmatprep.subr.bf16.mxu0 %v863_v0 }
  0x85   :  { %650 = vmatpush3.bf16.msra.mxu0 %v691_v24 }
  0x86   :  { %651 = vmatprep.subr.bf16.mxu0 %v863_v0 }
  0x89   :  { %652 = vmatpush3.bf16.msra.mxu0 %v692_v25 }
  0x8c   :  { %654 = vmatmul.mubr.bf16.vlgmr.msra.gmra.mrb[4].mxu0 %v677_v15 }
 0x13f   :  { %v196_v26 = vpop.f32.mrb[0].mxu0 }
 0x140   :  { %v615_v27 = vpop.f32.mrb[1].mxu0 }
 0x141   :  { %v199_v28 = vpop.f32.mrb[2].mxu0 }
 0x142   :  { %v558_v29 = vpack.c.bf16 %v199_v28, %v196_v26  ;;  %v616_v30 = vpop.f32.mrb[3].mxu0 }
 0x144   :  { %559 = vst [vmem:[#allocation13] sm:$0xff] %v558_v29  }
 0x145   :  { %792 = shalt.err (!%p789_p8)
}
 0x146   :  { %s793_s26 = scalar_lea.hbm %s1056_s4, 128 }
 0x147   :  { %p794_p9 = scmp.ne.s32.totalorder %s1056_s4, %s793_s26  ;;  %p797_p10 = scmp.lt.u32.totalorder %s793_s26, %s1056_s4 }
 0x149   :  { %p799_p11 = pnand %p797_p10, %p794_p9 }
 0x14b   :  { %802 = shalt.err (!%p799_p11)
}
 0x14c   :  { %479 = dma.vmem_to_hbm [thread:$0]  %s474_s21, 128, %s1056_s4, [#allocation7], %s859_s9, %s859_s9, %s860_s10   ;;  %v307_v31 = vpop.f32.mrb[0].mxu1 }
 0x14d   :  { %s866_s11 = smov [#allocation14]   ;;  %v635_v32 = vpop.f32.mrb[1].mxu1 }
 0x14e   :  { %s485_s0 = sshll.u32 %s866_s11, 4  ;;  %v310_v33 = vpop.f32.mrb[2].mxu1  ;;  %s486_s0 = int_to_ptr.vmem [resolvable:$true] %s485_s0 }
 0x14f   :  { %v563_v34 = vpack.c.bf16 %v310_v33, %v307_v31  ;;  %v636_v35 = vpop.f32.mrb[3].mxu1  ;;  %s803_s24 = scalar_lea.vmem %s486_s0, 128  ;;  %p808_p13 = scmp.lt.s32.totalorder %s486_s0, %s486_s0 }
 0x150   :  { %p804_p12 = scmp.ne.s32.totalorder %s486_s0, %s803_s24  ;;  %p809_p0 = scmp.lt.s32.totalorder %s803_s24, %s803_s24 }
 0x151   :  { %564 = vst [vmem:[#allocation14] sm:$0xff] %v563_v34  }
 0x152   :  { %p810_p1 = por %p809_p0, %p808_p13 }
 0x154   :  { %p811_p2 = pnand %p810_p1, %p804_p12 }
 0x156   :  { %814 = shalt.err (!%p811_p2)
}
 0x157   :  { %s815_s4 = scalar_lea.hbm %s1057_s5, 128 }
 0x158   :  { %p816_p3 = scmp.ne.s32.totalorder %s1057_s5, %s815_s4  ;;  %p819_p4 = scmp.lt.u32.totalorder %s815_s4, %s1057_s5 }
 0x15a   :  { %p821_p5 = pnand %p819_p4, %p816_p3 }
 0x15c   :  { %824 = shalt.err (!%p821_p5)
}
 0x15d   :  { %491 = dma.vmem_to_hbm [thread:$0]  %s486_s0, 128, %s1057_s5, [#allocation15], %s859_s9, %s859_s9, %s860_s10  }
 0x15e   :  { %s867_s20 = smov [#allocation16]  }
 0x15f   :  { %v418_v36 = vpop.f32.mrb[4].mxu0  ;;  %s497_s2 = sshll.u32 %s867_s20, 4  ;;  %s498_s2 = int_to_ptr.vmem [resolvable:$true] %s497_s2 }
 0x160   :  { %v655_v37 = vpop.f32.mrb[5].mxu0  ;;  %s825_s1 = scalar_lea.vmem %s498_s2, 128  ;;  %p830_p7 = scmp.lt.s32.totalorder %s498_s2, %s498_s2 }
 0x161   :  { %v421_v38 = vpop.f32.mrb[6].mxu0  ;;  %p826_p6 = scmp.ne.s32.totalorder %s498_s2, %s825_s1  ;;  %p831_p8 = scmp.lt.s32.totalorder %s825_s1, %s825_s1 }
 0x162   :  { %v568_v39 = vpack.c.bf16 %v421_v38, %v418_v36  ;;  %v656_v40 = vpop.f32.mrb[7].mxu0 }
 0x163   :  { %p832_p9 = por %p831_p8, %p830_p7 }
 0x164   :  { %569 = vst [vmem:[#allocation16] sm:$0xff] %v568_v39  }
 0x165   :  { %p833_p10 = pnand %p832_p9, %p826_p6 }
 0x167   :  { %836 = shalt.err (!%p833_p10)
}
 0x168   :  { %s837_s5 = scalar_lea.hbm %s1058_s6, 128 }
 0x169   :  { %p838_p11 = scmp.ne.s32.totalorder %s1058_s6, %s837_s5  ;;  %p841_p12 = scmp.lt.u32.totalorder %s837_s5, %s1058_s6 }
 0x16b   :  { %p843_p13 = pnand %p841_p12, %p838_p11 }
 0x16d   :  { %846 = shalt.err (!%p843_p13)
}
 0x16e   :  { %503 = dma.vmem_to_hbm [thread:$0]  %s498_s2, 128, %s1058_s6, [#allocation15], %s859_s9, %s859_s9, %s860_s10  }
 0x16f   :  { %853 = dma.done.wait [#allocation7], 128  }
 0x170   :  { %854 = vsyncadd [#allocation7], 4294967168 }
 0x171   :  { %855 = dma.done.wait [#allocation15], 256  }
 0x172   :  { %856 = vsyncadd [#allocation15], 4294967040 }
 0x173   :  { %513 = vsyncpa [#allocation6], 1 }
 0x174   :  { %514 = vsyncpa [#allocation9], 1 }
 0x175   :  { %515 = vsyncpa [#allocation12], 1 }
 0x176   :  { %516 = vsyncpa [#allocation7], 1 }
 0x177   :  { %517 = vsyncpa [#allocation15], 1 }

// kernel: bad_transformer_unit.11
= control target key start
LH: loop header
LB: loop body
LE: loop exit
PB: predicated region body
PF: predicated region fallthrough
CT: control target
= control target key end

     0   :  { %7 = vsyncpa [#allocation4], 0  ;;  %s401_s0 = inlined_call_operand.hbm [shape: bf16[16,128], index: 0, kind: input, shape index: {}]   ;;  %s402_s1 = inlined_call_operand.hbm [shape: bf16[128,128], index: 1, kind: input, shape index: {}]   ;;  %s403_s2 = inlined_call_operand.hbm [shape: bf16[16,128], index: 2, kind: output, shape index: {}]  }
   0x1   :  { %8 = vsyncpa [#allocation7], 0 }
   0x2   :  { %9 = vsyncpa [#allocation5], 0  ;;  %s334_s9 = smov [#allocation3]   ;;  %s262_s13 = scalar_lea.hbm %s401_s0, 128 }
   0x3   :  { %s15_s10 = sshll.u32 %s334_s9, 4  ;;  %p263_p0 = scmp.ne.s32.totalorder %s401_s0, %s262_s13  ;;  %s16_s10 = int_to_ptr.vmem [resolvable:$true] %s15_s10 }
   0x4   :  { %p266_p1 = scmp.lt.u32.totalorder %s262_s13, %s401_s0 }
   0x6   :  { %p268_p2 = pnand %p266_p1, %p263_p0 }
   0x8   :  { %271 = shalt.err (!%p268_p2)
}
   0x9   :  { %s272_s18 = scalar_lea.vmem %s16_s10, 128  ;;  %p277_p4 = scmp.lt.s32.totalorder %s16_s10, %s16_s10 }
   0xa   :  { %p273_p3 = scmp.ne.s32.totalorder %s16_s10, %s272_s18  ;;  %p278_p5 = scmp.lt.s32.totalorder %s272_s18, %s272_s18 }
   0xc   :  { %p279_p6 = por %p278_p5, %p277_p4 }
   0xe   :  { %p280_p7 = pnand %p279_p6, %p273_p3 }
  0x10   :  { %283 = shalt.err (!%p280_p7)
}
  0x11   :  { %s335_s19 = smov 64   ;;  %s336_s20 = smov 4  }
  0x12   :  { %21 = dma.hbm_to_vmem [thread:$0]  %s401_s0, 128, %s16_s10, [#allocation4], %s335_s19, %s335_s19, %s336_s20  }
  0x13   :  { %s337_s23 = smov [#allocation6]   ;;  %s284_s27 = scalar_lea.hbm %s402_s1, 1024 }
  0x14   :  { %s27_s24 = sshll.u32 %s337_s23, 4  ;;  %p285_p8 = scmp.ne.s32.totalorder %s402_s1, %s284_s27  ;;  %s28_s24 = int_to_ptr.vmem [resolvable:$true] %s27_s24 }
  0x15   :  { %p288_p9 = scmp.lt.u32.totalorder %s284_s27, %s402_s1 }
  0x17   :  { %p290_p10 = pnand %p288_p9, %p285_p8 }
  0x19   :  { %293 = shalt.err (!%p290_p10)
}
  0x1a   :  { %s294_s4 = scalar_lea.vmem %s28_s24, 1024  ;;  %p299_p12 = scmp.lt.s32.totalorder %s28_s24, %s28_s24 }
  0x1b   :  { %p295_p11 = scmp.ne.s32.totalorder %s28_s24, %s294_s4  ;;  %p300_p13 = scmp.lt.s32.totalorder %s294_s4, %s294_s4 }
  0x1d   :  { %p301_p0 = por %p300_p13, %p299_p12 }
  0x1f   :  { %p302_p1 = pnand %p301_p0, %p295_p11 }
  0x21   :  { %305 = shalt.err (!%p302_p1)
}
  0x22   :  { %33 = dma.hbm_to_vmem [thread:$0]  %s402_s1, 1024, %s28_s24, [#allocation7], %s335_s19, %s335_s19, %s336_s20  }
  0x23   :  { %328 = dma.done.wait [#allocation4], 128  }
  0x24   :  { %329 = vsyncadd [#allocation4], 4294967168 }
  0x25   :  { %330 = dma.done.wait [#allocation7], 1024  }
  0x26   :  { %331 = vsyncadd [#allocation7], 4294966272  ;;  %v338_v0 = vmov 0.0   ;;  %vm339_vm0 = vmmov 0   ;;  %v253_v1 = vld [vmem:[#allocation6] sm:$0xff]   ;;  %v254_v2 = vld [vmem:[#allocation6 + $0x8] sm:$0xff]  }
  0x27   :  { %226 = vmatprep.subr.bf16.mxu0 %v338_v0  ;;  %242 = vmatprep.mubr.msk.bf16.mxu0 %vm339_vm0, %v338_v0  ;;  %v255_v3 = vld [vmem:[#allocation6 + $0x10] sm:$0xff]   ;;  %v256_v4 = vld [vmem:[#allocation6 + $0x18] sm:$0xff]   ;;  %v257_v5 = vld [vmem:[#allocation6 + $0x20] sm:$0xff]   ;;  %s340_s1 = smov [#allocation8]  }
  0x28   :  { %227 = vmatpush3.bf16.msra.mxu0 %v253_v1  ;;  %v258_v6 = vld [vmem:[#allocation6 + $0x28] sm:$0xff]   ;;  %v259_v7 = vld [vmem:[#allocation6 + $0x30] sm:$0xff]   ;;  %v260_v8 = vld [vmem:[#allocation6 + $0x38] sm:$0xff]   ;;  %s186_s6 = sshll.u32 %s340_s1, 4  ;;  %s187_s6 = int_to_ptr.vmem [resolvable:$true] %s186_s6 }
  0x29   :  { %228 = vmatprep.subr.bf16.mxu0 %v338_v0  ;;  %v261_v9 = vld [vmem:[#allocation3] sm:$0xff]   ;;  %s306_s7 = scalar_lea.vmem %s187_s6, 128  ;;  %p311_p3 = scmp.lt.s32.totalorder %s187_s6, %s187_s6 }
  0x2a   :  { %p307_p2 = scmp.ne.s32.totalorder %s187_s6, %s306_s7  ;;  %p312_p4 = scmp.lt.s32.totalorder %s306_s7, %s306_s7 }
  0x2c   :  { %229 = vmatpush3.bf16.msra.mxu0 %v254_v2  ;;  %p313_p5 = por %p312_p4, %p311_p3 }
  0x2d   :  { %230 = vmatprep.subr.bf16.mxu0 %v338_v0 }
  0x2e   :  { %p314_p6 = pnand %p313_p5, %p307_p2 }
  0x30   :  { %231 = vmatpush3.bf16.msra.mxu0 %v255_v3 }
  0x31   :  { %232 = vmatprep.subr.bf16.mxu0 %v338_v0 }
  0x34   :  { %233 = vmatpush3.bf16.msra.mxu0 %v256_v4 }
  0x35   :  { %234 = vmatprep.subr.bf16.mxu0 %v338_v0 }
  0x38   :  { %235 = vmatpush3.bf16.msra.mxu0 %v257_v5 }
  0x39   :  { %236 = vmatprep.subr.bf16.mxu0 %v338_v0 }
  0x3c   :  { %237 = vmatpush3.bf16.msra.mxu0 %v258_v6 }
  0x3d   :  { %238 = vmatprep.subr.bf16.mxu0 %v338_v0 }
  0x40   :  { %239 = vmatpush3.bf16.msra.mxu0 %v259_v7 }
  0x41   :  { %240 = vmatprep.subr.bf16.mxu0 %v338_v0 }
  0x44   :  { %241 = vmatpush3.bf16.msra.mxu0 %v260_v8 }
  0x47   :  { %243 = vmatmul.mubr.bf16.vlgmr.msra.gmra.mrb[0].mxu0 %v261_v9 }
 0x11a   :  { %v155_v10 = vpop.f32.mrb[0].mxu0 }
 0x11b   :  { %v244_v11 = vpop.f32.mrb[1].mxu0 }
 0x11c   :  { %v158_v12 = vpop.f32.mrb[2].mxu0 }
 0x11d   :  { %v215_v13 = vpack.c.bf16 %v158_v12, %v155_v10  ;;  %v245_v14 = vpop.f32.mrb[3].mxu0 }
 0x11f   :  { %216 = vst [vmem:[#allocation8] sm:$0xff] %v215_v13  }
 0x120   :  { %317 = shalt.err (!%p314_p6)
}
 0x121   :  { %s318_s10 = scalar_lea.hbm %s403_s2, 128 }
 0x122   :  { %p319_p7 = scmp.ne.s32.totalorder %s403_s2, %s318_s10  ;;  %p322_p8 = scmp.lt.u32.totalorder %s318_s10, %s403_s2 }
 0x124   :  { %p324_p9 = pnand %p322_p8, %p319_p7 }
 0x126   :  { %327 = shalt.err (!%p324_p9)
}
 0x127   :  { %192 = dma.vmem_to_hbm [thread:$0]  %s187_s6, 128, %s403_s2, [#allocation5], %s335_s19, %s335_s19, %s336_s20  }
 0x128   :  { %332 = dma.done.wait [#allocation5], 128  }
 0x129   :  { %333 = vsyncadd [#allocation5], 4294967168 }
 0x12a   :  { %196 = vsyncpa [#allocation4], 1 }
 0x12b   :  { %197 = vsyncpa [#allocation7], 1 }
 0x12c   :  { %198 = vsyncpa [#allocation5], 1 }

</bundles_post_ra>
